<compile_context>
chip_gen: v5e
topology: v5e:2x2
jax: 0.10.0
libtpu: 0.0.40
codegen_flags: <defaults>
</compile_context>

<pallas_src>
import functools

import numpy as np
import jax
import jax.numpy as jnp
from jax.experimental import pallas as pl
from jax.experimental.pallas import tpu as pltpu


# ---------------------------------------------------------------------------
# Fused Pallas kernel: conv1 -> conv2 -> conv3 -> flatten -> fc
# ---------------------------------------------------------------------------
def encoder_kernel(xp_ref, w1_ref, b1_ref, w2_ref, b2_ref, w3_ref, b3_ref,
                   wfc_ref, bfc_ref, o_ref, p1_ref, p2_ref):
    nb = xp_ref.shape[0]                       # batch tile

    def im2col(ref, ho, wo):
        # ref: (NB, Hp, Wp, C) zero-padded (pad=1) activation in VMEM.
        # Tap (ky, kx) of the 3x3 / stride-2 conv is a strided read; rows of
        # the resulting matrix are ordered (n, h, w).
        c = ref.shape[3]
        cols = []
        for ky in range(3):
            for kx in range(3):
                tap = ref[:, pl.ds(ky, ho, stride=2), pl.ds(kx, wo, stride=2), :]
                cols.append(tap.reshape(nb * ho * wo, c))
        return jnp.concatenate(cols, axis=-1)  # (NB*ho*wo, 9*C)

    def conv_relu(lhs, w_ref, b_ref):
        y = jnp.dot(lhs, w_ref[...], preferred_element_type=jnp.float32)
        return jnp.maximum(y + b_ref[...], 0.0)

    # Spatial sizes derived from the scratch shapes.
    h1, d1 = p1_ref.shape[1] - 2, p1_ref.shape[2] - 2
    h2, d2 = p2_ref.shape[1] - 2, p2_ref.shape[2] - 2
    h3, d3 = h2 // 2, d2 // 2
    c1, c2 = p1_ref.shape[3], p2_ref.shape[3]

    # conv1: im2col straight from the padded input block.
    y1 = conv_relu(im2col(xp_ref, h1, d1), w1_ref, b1_ref)        # (NB*h1*d1, 32)

    # conv2: stage y1 in a zero-padded VMEM scratch, strided taps.
    p1_ref[...] = jnp.zeros_like(p1_ref)
    p1_ref[:, 1:h1 + 1, 1:d1 + 1, :] = y1.reshape(nb, h1, d1, c1)
    y2 = conv_relu(im2col(p1_ref, h2, d2), w2_ref, b2_ref)        # (NB*h2*d2, 64)

    # conv3
    p2_ref[...] = jnp.zeros_like(p2_ref)
    p2_ref[:, 1:h2 + 1, 1:d2 + 1, :] = y2.reshape(nb, h2, d2, c2)
    y3 = conv_relu(im2col(p2_ref, h3, d3), w3_ref, b3_ref)        # (NB*h3*d3, 128)

    # flatten: rows already in (n, h, w) order -> contiguous reshape, then a
    # single K = h3*d3*128 FC matmul (CHW order folded into wfc host-side).
    feat = y3.reshape(nb, h3 * d3 * y3.shape[1])
    o_ref[...] = (jnp.dot(feat, wfc_ref[...], preferred_element_type=jnp.float32)
                  + bfc_ref[...]).astype(o_ref.dtype)


# ---------------------------------------------------------------------------
# Wrapper glue
# ---------------------------------------------------------------------------
def _const_spec(shape):
    shape = tuple(int(s) for s in shape)
    return pl.BlockSpec(shape, lambda i: (0,) * len(shape))


@functools.partial(jax.jit, static_argnames=("embedding_dim", "batch_tile"))
def encoder_forward(x_nchw, kp, *, embedding_dim, batch_tile=None):
    """Fused Pallas forward pass.  x_nchw is NCHW like PyTorch."""
    n, cin, h, w = (int(s) for s in x_nchw.shape)
    emb_pad = int(kp["wfc"].shape[1])
    h1, d1 = h // 2, w // 2
    h2, d2 = h1 // 2, d1 // 2

    nb = n if batch_tile is None else int(batch_tile)
    assert n % nb == 0

    # Tiny host-side glue: NCHW -> NHWC + zero pad (pad=1).  Everything else
    # (im2col, 3 convs, flatten, FC) happens inside the single fused kernel.
    xp = jnp.pad(jnp.transpose(x_nchw, (0, 2, 3, 1)),
                 ((0, 0), (1, 1), (1, 1), (0, 0)))

    weight_args = (kp["w1"], kp["b1"], kp["w2"], kp["b2"], kp["w3"], kp["b3"],
                   kp["wfc"], kp["bfc"])

    grid_spec = pltpu.PrefetchScalarGridSpec(
        num_scalar_prefetch=0,
        grid=(n // nb,),                                 # batch tiles
        in_specs=[pl.BlockSpec((nb, h + 2, w + 2, cin), lambda i: (i, 0, 0, 0))]
                 + [_const_spec(a.shape) for a in weight_args],
        out_specs=pl.BlockSpec((nb, emb_pad), lambda i: (i, 0)),
        scratch_shapes=[pltpu.VMEM((nb, h1 + 2, d1 + 2, 32), jnp.float32),
                        pltpu.VMEM((nb, h2 + 2, d2 + 2, 64), jnp.float32)],
    )
    out = pl.pallas_call(
        encoder_kernel,
        out_shape=jax.ShapeDtypeStruct((n, emb_pad), jnp.float32),
        grid_spec=grid_spec,
        compiler_params=pltpu.CompilerParams(
            dimension_semantics=("parallel",)),          # megacore batch split
    )(xp, *weight_args)
    return out[:, :embedding_dim]                        # drop lane padding


# ---------------------------------------------------------------------------
# Parameter preparation (host-side, one-time)
# ---------------------------------------------------------------------------
def pack_params(params, image_size, embedding_dim):
    """Convert PyTorch-layout params into the fused kernel's layouts."""
    def conv_w(w_oihw):
        cout, cin = int(w_oihw.shape[0]), int(w_oihw.shape[1])
        # (Cout, Cin, 3, 3) -> (3, 3, Cin, Cout) -> (9*Cin, Cout)  [im2col cols]
        return jnp.transpose(w_oihw, (2, 3, 1, 0)).reshape(9 * cin, cout)

    s3 = image_size // 8
    emb_pad = ((embedding_dim + 127) // 128) * 128
    # Fold PyTorch's CHW flatten order into the FC weight (rows ordered
    # (h, w, c) to match the kernel's NHWC flatten) and zero-pad the embedding
    # dim to a lane-dense multiple of 128.
    wfc = params["fc_w"].reshape(embedding_dim, 128, s3 * s3)      # (E, C, HW)
    wfc = jnp.transpose(wfc, (2, 1, 0)).reshape(s3 * s3 * 128, embedding_dim)
    wfc = jnp.pad(wfc, ((0, 0), (0, emb_pad - embedding_dim)))
    bfc = jnp.pad(params["fc_b"], ((0, emb_pad - embedding_dim),)).reshape(1, -1)

    return dict(
        w1=conv_w(params["conv1_w"]), b1=params["conv1_b"].reshape(1, -1),
        w2=conv_w(params["conv2_w"]), b2=params["conv2_b"].reshape(1, -1),
        w3=conv_w(params["conv3_w"]), b3=params["conv3_b"].reshape(1, -1),
        wfc=wfc, bfc=bfc,
    )


def init_params(key, channels, image_size, embedding_dim):
    """Deterministic synthetic parameters in PyTorch layout."""
    ks = jax.random.split(key, 8)

    def conv(k, cout, cin):
        return jax.random.normal(k, (cout, cin, 3, 3), jnp.float32) / np.sqrt(cin * 9)

    flat = (image_size // 8) ** 2 * 128
    return dict(
        conv1_w=conv(ks[0], 32, channels),
        conv1_b=jax.random.normal(ks[1], (32,), jnp.float32) * 0.01,
        conv2_w=conv(ks[2], 64, 32),
        conv2_b=jax.random.normal(ks[3], (64,), jnp.float32) * 0.01,
        conv3_w=conv(ks[4], 128, 64),
        conv3_b=jax.random.normal(ks[5], (128,), jnp.float32) * 0.01,
        fc_w=jax.random.normal(ks[6], (embedding_dim, flat), jnp.float32) / np.sqrt(flat),
        fc_b=jax.random.normal(ks[7], (embedding_dim,), jnp.float32) * 0.01,
    )


# ---------------------------------------------------------------------------
# Pure-JAX reference (mirrors the PyTorch module exactly)
# ---------------------------------------------------------------------------
def encoder_reference(x_nchw, params):
    x = jnp.transpose(x_nchw, (0, 2, 3, 1))
    for wn, bn in (("conv1_w", "conv1_b"), ("conv2_w", "conv2_b"), ("conv3_w", "conv3_b")):
        w = jnp.transpose(params[wn], (2, 3, 1, 0))           # OIHW -> HWIO
        x = jax.lax.conv_general_dilated(
            x, w, window_strides=(2, 2), padding=((1, 1), (1, 1)),
            dimension_numbers=("NHWC", "HWIO", "NHWC"))
        x = jax.nn.relu(x + params[bn])
    x = jnp.transpose(x, (0, 3, 1, 2)).reshape(x.shape[0], -1)  # PyTorch CHW flatten
    return x @ params["fc_w"].T + params["fc_b"]


if __name__ == "__main__":
    batch, channels, image_size, embedding_dim = 2, 4, 16, 32

    key = jax.random.PRNGKey(0)
    k_x, k_p = jax.random.split(key)
    x = jax.random.normal(k_x, (batch, channels, image_size, image_size), jnp.float32)
    params = init_params(k_p, channels, image_size, embedding_dim)
    kparams = pack_params(params, image_size, embedding_dim)

    out = jax.block_until_ready(
        encoder_forward(x, kparams, embedding_dim=embedding_dim))

    ref = jax.block_until_ready(encoder_reference(x, params))
    np.testing.assert_allclose(np.asarray(out), np.asarray(ref), rtol=1e-4, atol=1e-4)
    assert out.shape == (batch, embedding_dim)

    print("KERNEL_OK")
</pallas_src>

<mosaic_0001>
module attributes {stable_mosaic.version = 11 : i64} {
  func.func @encoder_kernel(%arg0: i32, %arg1: memref<2x18x18x4xf32, #tpu.memory_space<vmem>>, %arg2: memref<36x32xf32, #tpu.memory_space<vmem>>, %arg3: memref<1x32xf32, #tpu.memory_space<vmem>>, %arg4: memref<288x64xf32, #tpu.memory_space<vmem>>, %arg5: memref<1x64xf32, #tpu.memory_space<vmem>>, %arg6: memref<576x128xf32, #tpu.memory_space<vmem>>, %arg7: memref<1x128xf32, #tpu.memory_space<vmem>>, %arg8: memref<512x128xf32, #tpu.memory_space<vmem>>, %arg9: memref<1x128xf32, #tpu.memory_space<vmem>>, %arg10: memref<2x128xf32, #tpu.memory_space<vmem>>, %arg11: memref<2x10x10x32xf32, #tpu.memory_space<vmem>>, %arg12: memref<2x6x6x64xf32, #tpu.memory_space<vmem>>) attributes {dimension_semantics = [#tpu.dimension_semantics<parallel>], iteration_bounds = array<i64: 1>, scalar_prefetch = 0 : i64, scratch_operands = 2 : i64, tpu.core_type = #tpu.core_type<tc>, window_params = [{transform_indices = @transform_0, window_bounds = array<i64: 2, 18, 18, 4>}, {pipeline_mode = #tpu.pipeline_mode<synchronous>, transform_indices = @transform_1, window_bounds = array<i64: 36, 32>}, {pipeline_mode = #tpu.pipeline_mode<synchronous>, transform_indices = @transform_2, window_bounds = array<i64: 1, 32>}, {pipeline_mode = #tpu.pipeline_mode<synchronous>, transform_indices = @transform_3, window_bounds = array<i64: 288, 64>}, {pipeline_mode = #tpu.pipeline_mode<synchronous>, transform_indices = @transform_4, window_bounds = array<i64: 1, 64>}, {pipeline_mode = #tpu.pipeline_mode<synchronous>, transform_indices = @transform_5, window_bounds = array<i64: 576, 128>}, {pipeline_mode = #tpu.pipeline_mode<synchronous>, transform_indices = @transform_6, window_bounds = array<i64: 1, 128>}, {pipeline_mode = #tpu.pipeline_mode<synchronous>, transform_indices = @transform_7, window_bounds = array<i64: 512, 128>}, {pipeline_mode = #tpu.pipeline_mode<synchronous>, transform_indices = @transform_8, window_bounds = array<i64: 1, 128>}, {transform_indices = @transform_9, window_bounds = array<i64: 2, 128>}]} {
    %c0 = arith.constant 0 : index
    %c0_0 = arith.constant 0 : index
    %c0_1 = arith.constant 0 : index
    %c0_2 = arith.constant 0 : index
    %0 = tpu.strided_load %arg1[%c0, %c0_0, %c0_1, %c0_2] {strides = array<i32: 1, 2, 2, 1>} : memref<2x18x18x4xf32, #tpu.memory_space<vmem>>, vector<2x8x8x4xf32>
    %1 = vector.shape_cast %0 : vector<2x8x8x4xf32> to vector<128x4xf32>
    %c0_3 = arith.constant 0 : index
    %c0_4 = arith.constant 0 : index
    %c1 = arith.constant 1 : index
    %c0_5 = arith.constant 0 : index
    %2 = tpu.strided_load %arg1[%c0_3, %c0_4, %c1, %c0_5] {strides = array<i32: 1, 2, 2, 1>} : memref<2x18x18x4xf32, #tpu.memory_space<vmem>>, vector<2x8x8x4xf32>
    %3 = vector.shape_cast %2 : vector<2x8x8x4xf32> to vector<128x4xf32>
    %c0_6 = arith.constant 0 : index
    %c0_7 = arith.constant 0 : index
    %c2 = arith.constant 2 : index
    %c0_8 = arith.constant 0 : index
    %4 = tpu.strided_load %arg1[%c0_6, %c0_7, %c2, %c0_8] {strides = array<i32: 1, 2, 2, 1>} : memref<2x18x18x4xf32, #tpu.memory_space<vmem>>, vector<2x8x8x4xf32>
    %5 = vector.shape_cast %4 : vector<2x8x8x4xf32> to vector<128x4xf32>
    %c0_9 = arith.constant 0 : index
    %c1_10 = arith.constant 1 : index
    %c0_11 = arith.constant 0 : index
    %c0_12 = arith.constant 0 : index
    %6 = tpu.strided_load %arg1[%c0_9, %c1_10, %c0_11, %c0_12] {strides = array<i32: 1, 2, 2, 1>} : memref<2x18x18x4xf32, #tpu.memory_space<vmem>>, vector<2x8x8x4xf32>
    %7 = vector.shape_cast %6 : vector<2x8x8x4xf32> to vector<128x4xf32>
    %c0_13 = arith.constant 0 : index
    %c1_14 = arith.constant 1 : index
    %c1_15 = arith.constant 1 : index
    %c0_16 = arith.constant 0 : index
    %8 = tpu.strided_load %arg1[%c0_13, %c1_14, %c1_15, %c0_16] {strides = array<i32: 1, 2, 2, 1>} : memref<2x18x18x4xf32, #tpu.memory_space<vmem>>, vector<2x8x8x4xf32>
    %9 = vector.shape_cast %8 : vector<2x8x8x4xf32> to vector<128x4xf32>
    %c0_17 = arith.constant 0 : index
    %c1_18 = arith.constant 1 : index
    %c2_19 = arith.constant 2 : index
    %c0_20 = arith.constant 0 : index
    %10 = tpu.strided_load %arg1[%c0_17, %c1_18, %c2_19, %c0_20] {strides = array<i32: 1, 2, 2, 1>} : memref<2x18x18x4xf32, #tpu.memory_space<vmem>>, vector<2x8x8x4xf32>
    %11 = vector.shape_cast %10 : vector<2x8x8x4xf32> to vector<128x4xf32>
    %c0_21 = arith.constant 0 : index
    %c2_22 = arith.constant 2 : index
    %c0_23 = arith.constant 0 : index
    %c0_24 = arith.constant 0 : index
    %12 = tpu.strided_load %arg1[%c0_21, %c2_22, %c0_23, %c0_24] {strides = array<i32: 1, 2, 2, 1>} : memref<2x18x18x4xf32, #tpu.memory_space<vmem>>, vector<2x8x8x4xf32>
    %13 = vector.shape_cast %12 : vector<2x8x8x4xf32> to vector<128x4xf32>
    %c0_25 = arith.constant 0 : index
    %c2_26 = arith.constant 2 : index
    %c1_27 = arith.constant 1 : index
    %c0_28 = arith.constant 0 : index
    %14 = tpu.strided_load %arg1[%c0_25, %c2_26, %c1_27, %c0_28] {strides = array<i32: 1, 2, 2, 1>} : memref<2x18x18x4xf32, #tpu.memory_space<vmem>>, vector<2x8x8x4xf32>
    %15 = vector.shape_cast %14 : vector<2x8x8x4xf32> to vector<128x4xf32>
    %c0_29 = arith.constant 0 : index
    %c2_30 = arith.constant 2 : index
    %c2_31 = arith.constant 2 : index
    %c0_32 = arith.constant 0 : index
    %16 = tpu.strided_load %arg1[%c0_29, %c2_30, %c2_31, %c0_32] {strides = array<i32: 1, 2, 2, 1>} : memref<2x18x18x4xf32, #tpu.memory_space<vmem>>, vector<2x8x8x4xf32>
    %17 = vector.shape_cast %16 : vector<2x8x8x4xf32> to vector<128x4xf32>
    %18 = tpu.concatenate %1, %3, %5, %7, %9, %11, %13, %15, %17 in 1 : vector<128x4xf32>, vector<128x4xf32>, vector<128x4xf32>, vector<128x4xf32>, vector<128x4xf32>, vector<128x4xf32>, vector<128x4xf32>, vector<128x4xf32>, vector<128x4xf32> -> vector<128x36xf32>
    %c0_33 = arith.constant 0 : index
    %c0_34 = arith.constant 0 : index
    %19 = vector.load %arg2[%c0_33, %c0_34] : memref<36x32xf32, #tpu.memory_space<vmem>>, vector<36x32xf32>
    %cst = arith.constant dense<0.000000e+00> : vector<128x32xf32>
    %20 = tpu.matmul %18, %19, %cst {dimension_numbers = #tpu.dot_dimension_numbers<[1], [0], [0], [1], [0, 0, 1, 1], [], []>} : vector<128x36xf32>, vector<36x32xf32>, vector<128x32xf32> -> vector<128x32xf32>
    %c0_35 = arith.constant 0 : index
    %c0_36 = arith.constant 0 : index
    %21 = vector.load %arg3[%c0_35, %c0_36] : memref<1x32xf32, #tpu.memory_space<vmem>>, vector<1x32xf32>
    %22 = vector.broadcast %21 : vector<1x32xf32> to vector<128x32xf32>
    %23 = arith.addf %20, %22 : vector<128x32xf32>
    %cst_37 = arith.constant 0.000000e+00 : f32
    %24 = vector.broadcast %cst_37 : f32 to vector<128x32xf32>
    %25 = arith.maximumf %23, %24 : vector<128x32xf32>
    %cst_38 = arith.constant 0.000000e+00 : f32
    %26 = vector.broadcast %cst_38 : f32 to vector<2x10x10x32xf32>
    %c0_39 = arith.constant 0 : index
    %c0_40 = arith.constant 0 : index
    %c0_41 = arith.constant 0 : index
    %c0_42 = arith.constant 0 : index
    %27 = vector.load %arg11[%c0_39, %c0_40, %c0_41, %c0_42] : memref<2x10x10x32xf32, #tpu.memory_space<vmem>>, vector<2x10x10x32xf32>
    tpu.vector_store %arg11[%c0_39, %c0_40, %c0_41, %c0_42], %26 {strides = array<i32>} : memref<2x10x10x32xf32, #tpu.memory_space<vmem>>, vector<2x10x10x32xf32>,
    %28 = vector.shape_cast %25 : vector<128x32xf32> to vector<2x8x8x32xf32>
    %c0_43 = arith.constant 0 : index
    %c1_44 = arith.constant 1 : index
    %c1_45 = arith.constant 1 : index
    %c0_46 = arith.constant 0 : index
    %29 = vector.load %arg11[%c0_43, %c1_44, %c1_45, %c0_46] : memref<2x10x10x32xf32, #tpu.memory_space<vmem>>, vector<2x8x8x32xf32>
    tpu.vector_store %arg11[%c0_43, %c1_44, %c1_45, %c0_46], %28 {strides = array<i32>} : memref<2x10x10x32xf32, #tpu.memory_space<vmem>>, vector<2x8x8x32xf32>,
    %c0_47 = arith.constant 0 : index
    %c0_48 = arith.constant 0 : index
    %c0_49 = arith.constant 0 : index
    %c0_50 = arith.constant 0 : index
    %30 = tpu.strided_load %arg11[%c0_47, %c0_48, %c0_49, %c0_50] {strides = array<i32: 1, 2, 2, 1>} : memref<2x10x10x32xf32, #tpu.memory_space<vmem>>, vector<2x4x4x32xf32>
    %31 = vector.shape_cast %30 : vector<2x4x4x32xf32> to vector<32x32xf32>
    %c0_51 = arith.constant 0 : index
    %c0_52 = arith.constant 0 : index
    %c1_53 = arith.constant 1 : index
    %c0_54 = arith.constant 0 : index
    %32 = tpu.strided_load %arg11[%c0_51, %c0_52, %c1_53, %c0_54] {strides = array<i32: 1, 2, 2, 1>} : memref<2x10x10x32xf32, #tpu.memory_space<vmem>>, vector<2x4x4x32xf32>
    %33 = vector.shape_cast %32 : vector<2x4x4x32xf32> to vector<32x32xf32>
    %c0_55 = arith.constant 0 : index
    %c0_56 = arith.constant 0 : index
    %c2_57 = arith.constant 2 : index
    %c0_58 = arith.constant 0 : index
    %34 = tpu.strided_load %arg11[%c0_55, %c0_56, %c2_57, %c0_58] {strides = array<i32: 1, 2, 2, 1>} : memref<2x10x10x32xf32, #tpu.memory_space<vmem>>, vector<2x4x4x32xf32>
    %35 = vector.shape_cast %34 : vector<2x4x4x32xf32> to vector<32x32xf32>
    %c0_59 = arith.constant 0 : index
    %c1_60 = arith.constant 1 : index
    %c0_61 = arith.constant 0 : index
    %c0_62 = arith.constant 0 : index
    %36 = tpu.strided_load %arg11[%c0_59, %c1_60, %c0_61, %c0_62] {strides = array<i32: 1, 2, 2, 1>} : memref<2x10x10x32xf32, #tpu.memory_space<vmem>>, vector<2x4x4x32xf32>
    %37 = vector.shape_cast %36 : vector<2x4x4x32xf32> to vector<32x32xf32>
    %c0_63 = arith.constant 0 : index
    %c1_64 = arith.constant 1 : index
    %c1_65 = arith.constant 1 : index
    %c0_66 = arith.constant 0 : index
    %38 = tpu.strided_load %arg11[%c0_63, %c1_64, %c1_65, %c0_66] {strides = array<i32: 1, 2, 2, 1>} : memref<2x10x10x32xf32, #tpu.memory_space<vmem>>, vector<2x4x4x32xf32>
    %39 = vector.shape_cast %38 : vector<2x4x4x32xf32> to vector<32x32xf32>
    %c0_67 = arith.constant 0 : index
    %c1_68 = arith.constant 1 : index
    %c2_69 = arith.constant 2 : index
    %c0_70 = arith.constant 0 : index
    %40 = tpu.strided_load %arg11[%c0_67, %c1_68, %c2_69, %c0_70] {strides = array<i32: 1, 2, 2, 1>} : memref<2x10x10x32xf32, #tpu.memory_space<vmem>>, vector<2x4x4x32xf32>
    %41 = vector.shape_cast %40 : vector<2x4x4x32xf32> to vector<32x32xf32>
    %c0_71 = arith.constant 0 : index
    %c2_72 = arith.constant 2 : index
    %c0_73 = arith.constant 0 : index
    %c0_74 = arith.constant 0 : index
    %42 = tpu.strided_load %arg11[%c0_71, %c2_72, %c0_73, %c0_74] {strides = array<i32: 1, 2, 2, 1>} : memref<2x10x10x32xf32, #tpu.memory_space<vmem>>, vector<2x4x4x32xf32>
    %43 = vector.shape_cast %42 : vector<2x4x4x32xf32> to vector<32x32xf32>
    %c0_75 = arith.constant 0 : index
    %c2_76 = arith.constant 2 : index
    %c1_77 = arith.constant 1 : index
    %c0_78 = arith.constant 0 : index
    %44 = tpu.strided_load %arg11[%c0_75, %c2_76, %c1_77, %c0_78] {strides = array<i32: 1, 2, 2, 1>} : memref<2x10x10x32xf32, #tpu.memory_space<vmem>>, vector<2x4x4x32xf32>
    %45 = vector.shape_cast %44 : vector<2x4x4x32xf32> to vector<32x32xf32>
    %c0_79 = arith.constant 0 : index
    %c2_80 = arith.constant 2 : index
    %c2_81 = arith.constant 2 : index
    %c0_82 = arith.constant 0 : index
    %46 = tpu.strided_load %arg11[%c0_79, %c2_80, %c2_81, %c0_82] {strides = array<i32: 1, 2, 2, 1>} : memref<2x10x10x32xf32, #tpu.memory_space<vmem>>, vector<2x4x4x32xf32>
    %47 = vector.shape_cast %46 : vector<2x4x4x32xf32> to vector<32x32xf32>
    %48 = tpu.concatenate %31, %33, %35, %37, %39, %41, %43, %45, %47 in 1 : vector<32x32xf32>, vector<32x32xf32>, vector<32x32xf32>, vector<32x32xf32>, vector<32x32xf32>, vector<32x32xf32>, vector<32x32xf32>, vector<32x32xf32>, vector<32x32xf32> -> vector<32x288xf32>
    %c0_83 = arith.constant 0 : index
    %c0_84 = arith.constant 0 : index
    %49 = vector.load %arg4[%c0_83, %c0_84] : memref<288x64xf32, #tpu.memory_space<vmem>>, vector<288x64xf32>
    %cst_85 = arith.constant dense<0.000000e+00> : vector<32x64xf32>
    %50 = tpu.matmul %48, %49, %cst_85 {dimension_numbers = #tpu.dot_dimension_numbers<[1], [0], [0], [1], [0, 0, 1, 1], [], []>} : vector<32x288xf32>, vector<288x64xf32>, vector<32x64xf32> -> vector<32x64xf32>
    %c0_86 = arith.constant 0 : index
    %c0_87 = arith.constant 0 : index
    %51 = vector.load %arg5[%c0_86, %c0_87] : memref<1x64xf32, #tpu.memory_space<vmem>>, vector<1x64xf32>
    %52 = vector.broadcast %51 : vector<1x64xf32> to vector<32x64xf32>
    %53 = arith.addf %50, %52 : vector<32x64xf32>
    %cst_88 = arith.constant 0.000000e+00 : f32
    %54 = vector.broadcast %cst_88 : f32 to vector<32x64xf32>
    %55 = arith.maximumf %53, %54 : vector<32x64xf32>
    %cst_89 = arith.constant 0.000000e+00 : f32
    %56 = vector.broadcast %cst_89 : f32 to vector<2x6x6x64xf32>
    %c0_90 = arith.constant 0 : index
    %c0_91 = arith.constant 0 : index
    %c0_92 = arith.constant 0 : index
    %c0_93 = arith.constant 0 : index
    %57 = vector.load %arg12[%c0_90, %c0_91, %c0_92, %c0_93] : memref<2x6x6x64xf32, #tpu.memory_space<vmem>>, vector<2x6x6x64xf32>
    tpu.vector_store %arg12[%c0_90, %c0_91, %c0_92, %c0_93], %56 {strides = array<i32>} : memref<2x6x6x64xf32, #tpu.memory_space<vmem>>, vector<2x6x6x64xf32>,
    %58 = vector.shape_cast %55 : vector<32x64xf32> to vector<2x4x4x64xf32>
    %c0_94 = arith.constant 0 : index
    %c1_95 = arith.constant 1 : index
    %c1_96 = arith.constant 1 : index
    %c0_97 = arith.constant 0 : index
    %59 = vector.load %arg12[%c0_94, %c1_95, %c1_96, %c0_97] : memref<2x6x6x64xf32, #tpu.memory_space<vmem>>, vector<2x4x4x64xf32>
    tpu.vector_store %arg12[%c0_94, %c1_95, %c1_96, %c0_97], %58 {strides = array<i32>} : memref<2x6x6x64xf32, #tpu.memory_space<vmem>>, vector<2x4x4x64xf32>,
    %c0_98 = arith.constant 0 : index
    %c0_99 = arith.constant 0 : index
    %c0_100 = arith.constant 0 : index
    %c0_101 = arith.constant 0 : index
    %60 = tpu.strided_load %arg12[%c0_98, %c0_99, %c0_100, %c0_101] {strides = array<i32: 1, 2, 2, 1>} : memref<2x6x6x64xf32, #tpu.memory_space<vmem>>, vector<2x2x2x64xf32>
    %61 = vector.shape_cast %60 : vector<2x2x2x64xf32> to vector<8x64xf32>
    %c0_102 = arith.constant 0 : index
    %c0_103 = arith.constant 0 : index
    %c1_104 = arith.constant 1 : index
    %c0_105 = arith.constant 0 : index
    %62 = tpu.strided_load %arg12[%c0_102, %c0_103, %c1_104, %c0_105] {strides = array<i32: 1, 2, 2, 1>} : memref<2x6x6x64xf32, #tpu.memory_space<vmem>>, vector<2x2x2x64xf32>
    %63 = vector.shape_cast %62 : vector<2x2x2x64xf32> to vector<8x64xf32>
    %c0_106 = arith.constant 0 : index
    %c0_107 = arith.constant 0 : index
    %c2_108 = arith.constant 2 : index
    %c0_109 = arith.constant 0 : index
    %64 = tpu.strided_load %arg12[%c0_106, %c0_107, %c2_108, %c0_109] {strides = array<i32: 1, 2, 2, 1>} : memref<2x6x6x64xf32, #tpu.memory_space<vmem>>, vector<2x2x2x64xf32>
    %65 = vector.shape_cast %64 : vector<2x2x2x64xf32> to vector<8x64xf32>
    %c0_110 = arith.constant 0 : index
    %c1_111 = arith.constant 1 : index
    %c0_112 = arith.constant 0 : index
    %c0_113 = arith.constant 0 : index
    %66 = tpu.strided_load %arg12[%c0_110, %c1_111, %c0_112, %c0_113] {strides = array<i32: 1, 2, 2, 1>} : memref<2x6x6x64xf32, #tpu.memory_space<vmem>>, vector<2x2x2x64xf32>
    %67 = vector.shape_cast %66 : vector<2x2x2x64xf32> to vector<8x64xf32>
    %c0_114 = arith.constant 0 : index
    %c1_115 = arith.constant 1 : index
    %c1_116 = arith.constant 1 : index
    %c0_117 = arith.constant 0 : index
    %68 = tpu.strided_load %arg12[%c0_114, %c1_115, %c1_116, %c0_117] {strides = array<i32: 1, 2, 2, 1>} : memref<2x6x6x64xf32, #tpu.memory_space<vmem>>, vector<2x2x2x64xf32>
    %69 = vector.shape_cast %68 : vector<2x2x2x64xf32> to vector<8x64xf32>
    %c0_118 = arith.constant 0 : index
    %c1_119 = arith.constant 1 : index
    %c2_120 = arith.constant 2 : index
    %c0_121 = arith.constant 0 : index
    %70 = tpu.strided_load %arg12[%c0_118, %c1_119, %c2_120, %c0_121] {strides = array<i32: 1, 2, 2, 1>} : memref<2x6x6x64xf32, #tpu.memory_space<vmem>>, vector<2x2x2x64xf32>
    %71 = vector.shape_cast %70 : vector<2x2x2x64xf32> to vector<8x64xf32>
    %c0_122 = arith.constant 0 : index
    %c2_123 = arith.constant 2 : index
    %c0_124 = arith.constant 0 : index
    %c0_125 = arith.constant 0 : index
    %72 = tpu.strided_load %arg12[%c0_122, %c2_123, %c0_124, %c0_125] {strides = array<i32: 1, 2, 2, 1>} : memref<2x6x6x64xf32, #tpu.memory_space<vmem>>, vector<2x2x2x64xf32>
    %73 = vector.shape_cast %72 : vector<2x2x2x64xf32> to vector<8x64xf32>
    %c0_126 = arith.constant 0 : index
    %c2_127 = arith.constant 2 : index
    %c1_128 = arith.constant 1 : index
    %c0_129 = arith.constant 0 : index
    %74 = tpu.strided_load %arg12[%c0_126, %c2_127, %c1_128, %c0_129] {strides = array<i32: 1, 2, 2, 1>} : memref<2x6x6x64xf32, #tpu.memory_space<vmem>>, vector<2x2x2x64xf32>
    %75 = vector.shape_cast %74 : vector<2x2x2x64xf32> to vector<8x64xf32>
    %c0_130 = arith.constant 0 : index
    %c2_131 = arith.constant 2 : index
    %c2_132 = arith.constant 2 : index
    %c0_133 = arith.constant 0 : index
    %76 = tpu.strided_load %arg12[%c0_130, %c2_131, %c2_132, %c0_133] {strides = array<i32: 1, 2, 2, 1>} : memref<2x6x6x64xf32, #tpu.memory_space<vmem>>, vector<2x2x2x64xf32>
    %77 = vector.shape_cast %76 : vector<2x2x2x64xf32> to vector<8x64xf32>
    %78 = tpu.concatenate %61, %63, %65, %67, %69, %71, %73, %75, %77 in 1 : vector<8x64xf32>, vector<8x64xf32>, vector<8x64xf32>, vector<8x64xf32>, vector<8x64xf32>, vector<8x64xf32>, vector<8x64xf32>, vector<8x64xf32>, vector<8x64xf32> -> vector<8x576xf32>
    %c0_134 = arith.constant 0 : index
    %c0_135 = arith.constant 0 : index
    %79 = vector.load %arg6[%c0_134, %c0_135] : memref<576x128xf32, #tpu.memory_space<vmem>>, vector<576x128xf32>
    %cst_136 = arith.constant dense<0.000000e+00> : vector<8x128xf32>
    %80 = tpu.matmul %78, %79, %cst_136 {dimension_numbers = #tpu.dot_dimension_numbers<[1], [0], [0], [1], [0, 0, 1, 1], [], []>} : vector<8x576xf32>, vector<576x128xf32>, vector<8x128xf32> -> vector<8x128xf32>
    %c0_137 = arith.constant 0 : index
    %c0_138 = arith.constant 0 : index
    %81 = vector.load %arg7[%c0_137, %c0_138] : memref<1x128xf32, #tpu.memory_space<vmem>>, vector<1x128xf32>
    %82 = vector.broadcast %81 : vector<1x128xf32> to vector<8x128xf32>
    %83 = arith.addf %80, %82 : vector<8x128xf32>
    %cst_139 = arith.constant 0.000000e+00 : f32
    %84 = vector.broadcast %cst_139 : f32 to vector<8x128xf32>
    %85 = arith.maximumf %83, %84 : vector<8x128xf32>
    %86 = vector.shape_cast %85 : vector<8x128xf32> to vector<2x512xf32>
    %c0_140 = arith.constant 0 : index
    %c0_141 = arith.constant 0 : index
    %87 = vector.load %arg8[%c0_140, %c0_141] : memref<512x128xf32, #tpu.memory_space<vmem>>, vector<512x128xf32>
    %cst_142 = arith.constant dense<0.000000e+00> : vector<2x128xf32>
    %88 = tpu.matmul %86, %87, %cst_142 {dimension_numbers = #tpu.dot_dimension_numbers<[1], [0], [0], [1], [0, 0, 1, 1], [], []>} : vector<2x512xf32>, vector<512x128xf32>, vector<2x128xf32> -> vector<2x128xf32>
    %c0_143 = arith.constant 0 : index
    %c0_144 = arith.constant 0 : index
    %89 = vector.load %arg9[%c0_143, %c0_144] : memref<1x128xf32, #tpu.memory_space<vmem>>, vector<1x128xf32>
    %90 = vector.broadcast %89 : vector<1x128xf32> to vector<2x128xf32>
    %91 = arith.addf %88, %90 : vector<2x128xf32>
    %c0_145 = arith.constant 0 : index
    %c0_146 = arith.constant 0 : index
    %92 = vector.load %arg10[%c0_145, %c0_146] : memref<2x128xf32, #tpu.memory_space<vmem>>, vector<2x128xf32>
    tpu.vector_store %arg10[%c0_145, %c0_146], %91 {strides = array<i32>} : memref<2x128xf32, #tpu.memory_space<vmem>>, vector<2x128xf32>,
    return
  }
  func.func @transform_0(%arg0: i32) -> (i32, i32, i32, i32) {
    %c0_i32 = arith.constant 0 : i32
    %c0_i32_0 = arith.constant 0 : i32
    %c0_i32_1 = arith.constant 0 : i32
    %c0_i32_2 = arith.constant 0 : i32
    return %arg0, %c0_i32, %c0_i32_0, %c0_i32_1 : i32, i32, i32, i32
  }
  func.func @transform_1(%arg0: i32) -> (i32, i32) {
    %c0_i32 = arith.constant 0 : i32
    %c0_i32_0 = arith.constant 0 : i32
    %c0_i32_1 = arith.constant 0 : i32
    return %c0_i32, %c0_i32_0 : i32, i32
  }
  func.func @transform_2(%arg0: i32) -> (i32, i32) {
    %c0_i32 = arith.constant 0 : i32
    %c0_i32_0 = arith.constant 0 : i32
    %c0_i32_1 = arith.constant 0 : i32
    return %c0_i32, %c0_i32_0 : i32, i32
  }
  func.func @transform_3(%arg0: i32) -> (i32, i32) {
    %c0_i32 = arith.constant 0 : i32
    %c0_i32_0 = arith.constant 0 : i32
    %c0_i32_1 = arith.constant 0 : i32
    return %c0_i32, %c0_i32_0 : i32, i32
  }
  func.func @transform_4(%arg0: i32) -> (i32, i32) {
    %c0_i32 = arith.constant 0 : i32
    %c0_i32_0 = arith.constant 0 : i32
    %c0_i32_1 = arith.constant 0 : i32
    return %c0_i32, %c0_i32_0 : i32, i32
  }
  func.func @transform_5(%arg0: i32) -> (i32, i32) {
    %c0_i32 = arith.constant 0 : i32
    %c0_i32_0 = arith.constant 0 : i32
    %c0_i32_1 = arith.constant 0 : i32
    return %c0_i32, %c0_i32_0 : i32, i32
  }
  func.func @transform_6(%arg0: i32) -> (i32, i32) {
    %c0_i32 = arith.constant 0 : i32
    %c0_i32_0 = arith.constant 0 : i32
    %c0_i32_1 = arith.constant 0 : i32
    return %c0_i32, %c0_i32_0 : i32, i32
  }
  func.func @transform_7(%arg0: i32) -> (i32, i32) {
    %c0_i32 = arith.constant 0 : i32
    %c0_i32_0 = arith.constant 0 : i32
    %c0_i32_1 = arith.constant 0 : i32
    return %c0_i32, %c0_i32_0 : i32, i32
  }
  func.func @transform_8(%arg0: i32) -> (i32, i32) {
    %c0_i32 = arith.constant 0 : i32
    %c0_i32_0 = arith.constant 0 : i32
    %c0_i32_1 = arith.constant 0 : i32
    return %c0_i32, %c0_i32_0 : i32, i32
  }
  func.func @transform_9(%arg0: i32) -> (i32, i32) {
    %c0_i32 = arith.constant 0 : i32
    %c0_i32_0 = arith.constant 0 : i32
    return %arg0, %c0_i32 : i32, i32
  }
}

</mosaic_0001>

<bundles_post_ra>
// kernel: encoder_forward.1
= control target key start
LH: loop header
LB: loop body
LE: loop exit
PB: predicated region body
PF: predicated region fallthrough
CT: control target
= control target key end

     0   :  { %s2826_s13 = smov 4   ;;  %s2827_s14 = smov 12   ;;  %s4426_s0 = inlined_call_operand.vmem [shape: f32[2,18,18,4], index: 0, kind: input, shape index: {}]   ;;  %s4427_s1 = inlined_call_operand.vmem [shape: f32[36,32], index: 1, kind: input, shape index: {}]   ;;  %s4428_s2 = inlined_call_operand.vmem [shape: f32[1,32], index: 2, kind: input, shape index: {}]   ;;  %s4429_s3 = inlined_call_operand.vmem [shape: f32[288,64], index: 3, kind: input, shape index: {}]   ;;  %s4430_s4 = inlined_call_operand.vmem [shape: f32[1,64], index: 4, kind: input, shape index: {}]   ;;  %s4431_s5 = inlined_call_operand.vmem [shape: f32[576,128], index: 5, kind: input, shape index: {}]   ;;  %s4432_s6 = inlined_call_operand.vmem [shape: f32[1,128], index: 6, kind: input, shape index: {}]   ;;  %s4433_s7 = inlined_call_operand.vmem [shape: f32[512,128], index: 7, kind: input, shape index: {}]   ;;  %s4434_s8 = inlined_call_operand.vmem [shape: f32[1,128], index: 8, kind: input, shape index: {}]   ;;  %s4435_s9 = inlined_call_operand.hbm [shape: f32[2,128], index: 9, kind: output, shape index: {}]  }
   0x1   :  { %v2567_v0 = vld [vmem:[%s4426_s0 + $0x1] ss:$2 sm:$0xff]  ;;  %v2599_v1 = vld [vmem:[%s4426_s0 + $0x18] ss:$2 sm:$0xff]  ;;  %s2828_s17 = smov 20  }
   0x2   :  { %336 = vrot.lane.b32.xlu0 %v2567_v0, %s2826_s13  ;;  %464 = vrot.lane.b32.xlu1 %v2599_v1, %s2827_s14  ;;  %v2631_v2 = vld [vmem:[%s4426_s0 + $0x1a] ss:$2 sm:$0xff]  ;;  %v2615_v4 = vld [vmem:[%s4426_s0 + $0x19] ss:$2 sm:$0xff] }
   0x3   :  { %592 = vrot.lane.b32.xlu2 %v2631_v2, %s2828_s17  ;;  %v2583_v3 = vld [vmem:[%s4426_s0 + $0x2] ss:$2 sm:$0xff] }
   0x4   :  { %v2647_v5 = vld [vmem:[%s4426_s0 + $0x30] ss:$2 sm:$0xff] }
   0x5   :  { %14 = vsyncpa [#allocation5], 0  ;;  %s2829_s24 = smov 8   ;;  %s2830_s25 = smov 16   ;;  %v2663_v6 = vld [vmem:[%s4426_s0 + $0x31] ss:$2 sm:$0xff] }
   0x6   :  { %s2831_s26 = smov 24   ;;  %v2679_v7 = vld [vmem:[%s4426_s0 + $0x32] ss:$2 sm:$0xff]  ;;  %v2568_v8 = vld [vmem:[%s4426_s0 + $0x31] ss:$2 sm:$0xff]  ;;  %s2832_s12 = smov 28  }
   0x7   :  { %s2833_s15 = smov 32   ;;  %v2584_v9 = vld [vmem:[%s4426_s0 + $0x32] ss:$2 sm:$0xff]  ;;  %v2616_v11 = vld [vmem:[%s4426_s0 + $0x49] ss:$2 sm:$0xff]  ;;  %vm1026_vm0 = vcmask 1043456  }
   0x8   :  { %v2600_v10 = vld [vmem:[%s4426_s0 + $0x48] ss:$2 sm:$0xff]  ;;  %v2664_v14 = vld [vmem:[%s4426_s0 + $0x61] ss:$2 sm:$0xff]  ;;  %v2601_v18 = vld [vmem:[%s4426_s0 + $0x78] ss:$2 sm:$0xff] }
   0x9   :  { %v2632_v12 = vld [vmem:[%s4426_s0 + $0x4a] ss:$2 sm:$0xff]  ;;  %v2569_v16 = vld [vmem:[%s4426_s0 + $0x61] ss:$2 sm:$0xff]  ;;  %v2633_v20 = vld [vmem:[%s4426_s0 + $0x7a] ss:$2 sm:$0xff] }
   0xa   :  { %400 = vrot.lane.b32.xlu0 %v2583_v3, %s2829_s24  ;;  %528 = vrot.lane.b32.xlu1 %v2615_v4, %s2830_s25  ;;  %v2648_v13 = vld [vmem:[%s4426_s0 + $0x60] ss:$2 sm:$0xff]  ;;  %v2617_v19 = vld [vmem:[%s4426_s0 + $0x79] ss:$2 sm:$0xff]  ;;  %vm832_vm1 = vcmask 31744   ;;  %vm849_vm2 = vcmask 64512  }
   0xb   :  { %656 = vrot.lane.b32.xlu2 %v2647_v5, %s2831_s26  ;;  %v2680_v15 = vld [vmem:[%s4426_s0 + $0x62] ss:$2 sm:$0xff]  ;;  %v2665_v22 = vld [vmem:[%s4426_s0 + $0x91] ss:$2 sm:$0xff]  ;;  %v2681_v23 = vld [vmem:[%s4426_s0 + $0x92] ss:$2 sm:$0xff] }
   0xc   :  { %v2585_v17 = vld [vmem:[%s4426_s0 + $0x62] ss:$2 sm:$0xff]  ;;  %v2570_v24 = vld [vmem:[%s4426_s0 + $0x91] ss:$2 sm:$0xff]  ;;  %v2586_v25 = vld [vmem:[%s4426_s0 + $0x92] ss:$2 sm:$0xff] }
   0xd   :  { %v2649_v21 = vld [vmem:[%s4426_s0 + $0x90] ss:$2 sm:$0xff]  ;;  %v2618_v27 = vld [vmem:[%s4426_s0 + $0xa9] ss:$2 sm:$0xff]  ;;  %v2650_v29 = vld [vmem:[%s4426_s0 + $0xc0] ss:$2 sm:$0xff] }
   0xe   :  { %v2602_v26 = vld [vmem:[%s4426_s0 + $0xa8] ss:$2 sm:$0xff]  ;;  %v2666_v30 = vld [vmem:[%s4426_s0 + $0xc1] ss:$2 sm:$0xff]  ;;  %v2603_v34 = vld [vmem:[%s4426_s0 + $0xd8] ss:$2 sm:$0xff] }
   0xf   :  { %v2634_v28 = vld [vmem:[%s4426_s0 + $0xaa] ss:$2 sm:$0xff]  ;;  %v2571_v32 = vld [vmem:[%s4426_s0 + $0xc1] ss:$2 sm:$0xff]  ;;  %v2635_v38 = vld [vmem:[%s4426_s0 + $0xda] ss:$2 sm:$0xff] }
  0x10   :  { %v2682_v31 = vld [vmem:[%s4426_s0 + $0xc2] ss:$2 sm:$0xff]  ;;  %v2619_v35 = vld [vmem:[%s4426_s0 + $0xd9] ss:$2 sm:$0xff]  ;;  %v2683_v46 = vld [vmem:[%s4426_s0 + $0xf2] ss:$2 sm:$0xff] }
  0x11   :  { %v2587_v33 = vld [vmem:[%s4426_s0 + $0xc2] ss:$2 sm:$0xff]  ;;  %v971_v40 = vld [vmem:[%s4427_s1 + $0x18] sm:$0xff]  ;;  %v2620_v51 = vld [vmem:[%s4426_s0 + $0x109] ss:$2 sm:$0xff]  ;;  %vm866_vm3 = vcmask 97280  }
  0x12   :  { %720 = vrot.lane.b32.xlu0 %v2663_v6, %s2832_s12  ;;  %784 = vrot.lane.b32.xlu1 %v2679_v7, %s2833_s15  ;;  %v972_v37 = vld [vmem:[%s4427_s1 + $0x20] sm:$0xf]  ;;  %v2651_v39 = vld [vmem:[%s4426_s0 + $0xf0] ss:$2 sm:$0xff]  ;;  %vm883_vm4 = vcmask 130048   ;;  %vm900_vm5 = vcmask 162816  }
  0x13   :  { %338 = vrot.lane.b32.xlu2 %v2568_v8, %s2826_s13  ;;  %2695 = vmatpush.msk.msra.mxu0 %vm1026_vm0, %v972_v37  ;;  %v2667_v41 = vld [vmem:[%s4426_s0 + $0xf1] ss:$2 sm:$0xff]  ;;  %v969_v43 = vld [vmem:[%s4427_s1 + $0x8] sm:$0xff]  ;;  %v968_v45 = vld [vmem:[%s4427_s1] sm:$0xff]  ;;  %vm917_vm6 = vcmask 195584   ;;  %vm934_vm7 = vcmask 228352  }
  0x14   :  { %2717 = vmatpush.msk.msra.mxu3 %vm1026_vm0, %v972_v37  ;;  %v970_v42 = vld [vmem:[%s4427_s1 + $0x10] sm:$0xff]  ;;  %v2652_v56 = vld [vmem:[%s4426_s0 + $0x120] ss:$2 sm:$0xff]  ;;  %v2668_v57 = vld [vmem:[%s4426_s0 + $0x121] ss:$2 sm:$0xff]  ;;  %vm951_vm8 = vcmask 261120  }
  0x15   :  { %1042 = vmatpush.msra.mxu0 %v971_v40  ;;  %v2572_v47 = vld [vmem:[%s4426_s0 + $0xf1] ss:$2 sm:$0xff]  ;;  %v2588_v48 = vld [vmem:[%s4426_s0 + $0xf2] ss:$2 sm:$0xff]  ;;  %v2684_v58 = vld [vmem:[%s4426_s0 + $0x122] ss:$2 sm:$0xff] }
  0x16   :  { %2718 = vmatpush.msra.mxu3 %v971_v40  ;;  %v2604_v50 = vld [vmem:[%s4426_s0 + $0x108] ss:$2 sm:$0xff]  ;;  %v2573_v3 = vld [vmem:[%s4426_s0 + $0x121] ss:$2 sm:$0xff]  ;;  %v2605_v5 = vld [vmem:[%s4426_s0 + $0x138] ss:$2 sm:$0xff] }
  0x17   :  { %1043 = vmatpush.msra.mxu0 %v970_v42  ;;  %v2636_v52 = vld [vmem:[%s4426_s0 + $0x10a] ss:$2 sm:$0xff]  ;;  %vm977_vm9 = vcmask 293888   ;;  %vm1112_vm10 = vcmask 254976   ;;  %s2835_s23 = smov 64   ;;  %s2836_s27 = smov 96  }
  0x18   :  { %2719 = vmatpush.msra.mxu3 %v970_v42  ;;  %v33_v59 = vld [vmem:[%s4426_s0] ss:$2 sm:$0xff]  ;;  %vm1638_vm11 = vcmask 523264   ;;  %vm1643_vm12 = vcmask 785408   ;;  %vm1799_vm13 = vcmask 521216   ;;  %vm1825_vm14 = vcmask 519168  }
  0x19   :  { %1044 = vmatpush.msra.mxu0 %v969_v43  ;;  %v2589_v4 = vld [vmem:[%s4426_s0 + $0x122] ss:$2 sm:$0xff]  ;;  %s2838_s20 = smov [#allocation4]   ;;  %s2381_s22 = sshll.u32 %s4435_s9, 4  ;;  %s2382_s22 = int_to_ptr.hbm [resolvable:$true] %s2381_s22 }
  0x1a   :  { %402 = vrot.lane.b32.xlu0 %v2584_v9, %s2829_s24  ;;  %466 = vrot.lane.b32.xlu1 %v2600_v10, %s2827_s14  ;;  %v2553_v40 = vld [vmem:[%s4426_s0 + $0x60] ss:$2 sm:$0xff]  ;;  %s2379_s21 = sshll.u32 %s2838_s20, 4  ;;  %s2380_s21 = int_to_ptr.vmem [resolvable:$true] %s2379_s21 }
  0x1b   :  { %530 = vrot.lane.b32.xlu2 %v2616_v11, %s2830_s25  ;;  %2720 = vmatpush.msra.mxu3 %v969_v43  ;;  %v2654_v42 = vld [vmem:[%s4426_s0 + $0x180] ss:$2 sm:$0xff]  ;;  %v2670_v43 = vld [vmem:[%s4426_s0 + $0x181] ss:$2 sm:$0xff] }
  0x1c   :  { %1045 = vmatpush.msra.mxu0 %v968_v45 }
  0x1d   :  { %2721 = vmatpush.msra.mxu3 %v968_v45 }
  0x22   :  { %594 = vrot.lane.b32.xlu0 %v2632_v12, %s2828_s17  ;;  %658 = vrot.lane.b32.xlu1 %v2648_v13, %s2831_s26  ;;  %v2621_v13 = vld [vmem:[%s4426_s0 + $0x139] ss:$2 sm:$0xff] }
  0x23   :  { %722 = vrot.lane.b32.xlu2 %v2664_v14, %s2832_s12  ;;  %v2637_v14 = vld [vmem:[%s4426_s0 + $0x13a] ss:$2 sm:$0xff] }
  0x2a   :  { %786 = vrot.lane.b32.xlu0 %v2680_v15, %s2833_s15  ;;  %340 = vrot.lane.b32.xlu1 %v2569_v16, %s2826_s13  ;;  %v2653_v15 = vld [vmem:[%s4426_s0 + $0x150] ss:$2 sm:$0xff] }
  0x2b   :  { %404 = vrot.lane.b32.xlu2 %v2585_v17, %s2829_s24  ;;  %v2552_v16 = vld [vmem:[%s4426_s0 + $0x30] ss:$2 sm:$0xff] }
  0x32   :  { %468 = vrot.lane.b32.xlu0 %v2601_v18, %s2827_s14  ;;  %532 = vrot.lane.b32.xlu1 %v2617_v19, %s2830_s25 }
  0x33   :  { %596 = vrot.lane.b32.xlu2 %v2633_v20, %s2828_s17 }
  0x3a   :  { %660 = vrot.lane.b32.xlu0 %v2649_v21, %s2831_s26  ;;  %724 = vrot.lane.b32.xlu1 %v2665_v22, %s2832_s12  ;;  %v2669_v22 = vld [vmem:[%s4426_s0 + $0x151] ss:$2 sm:$0xff] }
  0x3b   :  { %788 = vrot.lane.b32.xlu2 %v2681_v23, %s2833_s15  ;;  %v2685_v23 = vld [vmem:[%s4426_s0 + $0x152] ss:$2 sm:$0xff] }
  0x42   :  { %342 = vrot.lane.b32.xlu0 %v2570_v24, %s2826_s13  ;;  %406 = vrot.lane.b32.xlu1 %v2586_v25, %s2829_s24  ;;  %v2574_v24 = vld [vmem:[%s4426_s0 + $0x151] ss:$2 sm:$0xff] }
  0x43   :  { %470 = vrot.lane.b32.xlu2 %v2602_v26, %s2827_s14 }
  0x4a   :  { %534 = vrot.lane.b32.xlu0 %v2618_v27, %s2830_s25  ;;  %598 = vrot.lane.b32.xlu1 %v2634_v28, %s2828_s17 }
  0x4b   :  { %662 = vrot.lane.b32.xlu2 %v2650_v29, %s2831_s26 }
  0x52   :  { %726 = vrot.lane.b32.xlu0 %v2666_v30, %s2832_s12  ;;  %790 = vrot.lane.b32.xlu1 %v2682_v31, %s2833_s15  ;;  %v2590_v31 = vld [vmem:[%s4426_s0 + $0x152] ss:$2 sm:$0xff] }
  0x53   :  { %344 = vrot.lane.b32.xlu2 %v2571_v32, %s2826_s13  ;;  %v2606_v32 = vld [vmem:[%s4426_s0 + $0x168] ss:$2 sm:$0xff] }
  0x5a   :  { %408 = vrot.lane.b32.xlu0 %v2587_v33, %s2829_s24  ;;  %472 = vrot.lane.b32.xlu1 %v2603_v34, %s2827_s14  ;;  %v2622_v33 = vld [vmem:[%s4426_s0 + $0x169] ss:$2 sm:$0xff] }
  0x5b   :  { %536 = vrot.lane.b32.xlu2 %v2619_v35, %s2830_s25 }
  0x5d   :  { %v3033_v36 = vpop.permute.xlu2 %592 }
  0x62   :  { %600 = vrot.lane.b32.xlu0 %v2635_v38, %s2828_s17  ;;  %664 = vrot.lane.b32.xlu1 %v2651_v39, %s2831_s26 }
  0x63   :  { %728 = vrot.lane.b32.xlu2 %v2667_v41, %s2832_s12  ;;  %v2638_v41 = vld [vmem:[%s4426_s0 + $0x16a] ss:$2 sm:$0xff] }
  0x65   :  { %v657_v44 = vpop.permute.xlu2 %656 }
  0x6a   :  { %792 = vrot.lane.b32.xlu0 %v2683_v46, %s2833_s15  ;;  %346 = vrot.lane.b32.xlu1 %v2572_v47, %s2826_s13 }
  0x6b   :  { %410 = vrot.lane.b32.xlu2 %v2588_v48, %s2829_s24 }
  0x6d   :  { %v339_v49 = vpop.permute.xlu2 %338 }
  0x6e   :  { %v834_v17 = vsel %vm832_vm1, %v2552_v16, %v339_v49  ;;  %v2608_v16 = vld [vmem:[%s4426_s0 + $0x1f8] ss:$2 sm:$0xff] }
  0x72   :  { %474 = vrot.lane.b32.xlu0 %v2604_v50, %s2827_s14  ;;  %538 = vrot.lane.b32.xlu1 %v2620_v51, %s2830_s25  ;;  %v2686_v50 = vld [vmem:[%s4426_s0 + $0x182] ss:$2 sm:$0xff]  ;;  %v2575_v51 = vld [vmem:[%s4426_s0 + $0x1b1] ss:$2 sm:$0xff] }
  0x73   :  { %602 = vrot.lane.b32.xlu2 %v2636_v52, %s2828_s17  ;;  %v2591_v52 = vld [vmem:[%s4426_s0 + $0x1b2] ss:$2 sm:$0xff] }
  0x74   :  { %v337_v53 = vpop.permute.xlu0 %336  ;;  %v465_v54 = vpop.permute.xlu1 %464 }
  0x75   :  { %v531_v55 = vpop.permute.xlu2 %530  ;;  %v833_v60 = vsel %vm832_vm1, %v33_v59, %v337_v53 }
  0x7a   :  { %666 = vrot.lane.b32.xlu0 %v2652_v56, %s2831_s26  ;;  %730 = vrot.lane.b32.xlu1 %v2668_v57, %s2832_s12 }
  0x7b   :  { %794 = vrot.lane.b32.xlu2 %v2684_v58, %s2833_s15 }
  0x7c   :  { %v401_v61 = vpop.permute.xlu0 %400  ;;  %v529_v62 = vpop.permute.xlu1 %528 }
  0x7d   :  { %v850_v63 = vsel %vm849_vm2, %v833_v60, %v401_v61  ;;  %v723_v0 = vpop.permute.xlu2 %722  ;;  %v2607_v61 = vld [vmem:[%s4426_s0 + $0x1c8] ss:$2 sm:$0xff] }
  0x7e   :  { %v867_v1 = vsel %vm866_vm3, %v850_v63, %v465_v54  ;;  %v2639_v63 = vld [vmem:[%s4426_s0 + $0x1ca] ss:$2 sm:$0xff] }
  0x7f   :  { %v884_v2 = vsel %vm883_vm4, %v867_v1, %v529_v62  ;;  %v2623_v62 = vld [vmem:[%s4426_s0 + $0x1c9] ss:$2 sm:$0xff]  ;;  %v2554_v1 = vld [vmem:[%s4426_s0 + $0x90] ss:$2 sm:$0xff] }
  0x80   :  { %v901_v6 = vsel %vm900_vm5, %v884_v2, %v3033_v36 }
  0x81   :  { %v918_v8 = vsel %vm917_vm6, %v901_v6, %v657_v44  ;;  %v2671_v6 = vld [vmem:[%s4426_s0 + $0x1e1] ss:$2 sm:$0xff] }
  0x82   :  { %348 = vrot.lane.b32.xlu0 %v2573_v3, %s2826_s13  ;;  %412 = vrot.lane.b32.xlu1 %v2589_v4, %s2829_s24 }
  0x83   :  { %476 = vrot.lane.b32.xlu2 %v2605_v5, %s2827_s14  ;;  %v2655_v5 = vld [vmem:[%s4426_s0 + $0x1e0] ss:$2 sm:$0xff] }
  0x84   :  { %v721_v7 = vpop.permute.xlu0 %720  ;;  %v785_v9 = vpop.permute.xlu1 %784 }
  0x85   :  { %v935_v10 = vsel %vm934_vm7, %v918_v8, %v721_v7  ;;  %v405_v11 = vpop.permute.xlu2 %404  ;;  %v2687_v7 = vld [vmem:[%s4426_s0 + $0x1e2] ss:$2 sm:$0xff] }
  0x86   :  { %v952_v12 = vsel %vm951_vm8, %v935_v10, %v785_v9 }
  0x87   :  { %2696 = vmatmul.msk.f32.vlgmr.msra.gmra.mxu0 %vm977_vm9, %v952_v12 }
  0x8a   :  { %540 = vrot.lane.b32.xlu0 %v2621_v13, %s2830_s25  ;;  %604 = vrot.lane.b32.xlu1 %v2637_v14, %s2828_s17  ;;  %v2576_v14 = vld [vmem:[%s4426_s0 + $0x1e1] ss:$2 sm:$0xff] }
  0x8b   :  { %668 = vrot.lane.b32.xlu2 %v2653_v15, %s2831_s26  ;;  %v2592_v15 = vld [vmem:[%s4426_s0 + $0x1e2] ss:$2 sm:$0xff] }
  0x8c   :  { %v403_v18 = vpop.permute.xlu0 %402  ;;  %v467_v19 = vpop.permute.xlu1 %466 }
  0x8d   :  { %v597_v20 = vpop.permute.xlu2 %596  ;;  %v851_v21 = vsel %vm849_vm2, %v834_v17, %v403_v18 }
  0x8e   :  { %v868_v25 = vsel %vm866_vm3, %v851_v21, %v467_v19 }
  0x8f   :  { %v885_v28 = vsel %vm883_vm4, %v868_v25, %v531_v55  ;;  %v2640_v25 = vld [vmem:[%s4426_s0 + $0x1fa] ss:$2 sm:$0xff] }
  0x92   :  { %732 = vrot.lane.b32.xlu0 %v2669_v22, %s2832_s12  ;;  %796 = vrot.lane.b32.xlu1 %v2685_v23, %s2833_s15 }
  0x93   :  { %350 = vrot.lane.b32.xlu2 %v2574_v24, %s2826_s13  ;;  %v2624_v24 = vld [vmem:[%s4426_s0 + $0x1f9] ss:$2 sm:$0xff] }
  0x94   :  { %v595_v26 = vpop.permute.xlu0 %594  ;;  %v659_v27 = vpop.permute.xlu1 %658 }
  0x95   :  { %v789_v29 = vpop.permute.xlu2 %788  ;;  %v902_v30 = vsel %vm900_vm5, %v885_v28, %v595_v26  ;;  %v2656_v26 = vld [vmem:[%s4426_s0 + $0x210] ss:$2 sm:$0xff] }
  0x96   :  { %v919_v34 = vsel %vm917_vm6, %v902_v30, %v659_v27  ;;  %v2555_v27 = vld [vmem:[%s4426_s0 + $0xc0] ss:$2 sm:$0xff] }
  0x97   :  { %v936_v37 = vsel %vm934_vm7, %v919_v34, %v723_v0  ;;  %v2688_v34 = vld [vmem:[%s4426_s0 + $0x212] ss:$2 sm:$0xff] }
  0x9a   :  { %414 = vrot.lane.b32.xlu0 %v2590_v31, %s2829_s24  ;;  %478 = vrot.lane.b32.xlu1 %v2606_v32, %s2827_s14 }
  0x9b   :  { %542 = vrot.lane.b32.xlu2 %v2622_v33, %s2830_s25  ;;  %v2672_v33 = vld [vmem:[%s4426_s0 + $0x211] ss:$2 sm:$0xff] }
  0x9c   :  { %v787_v35 = vpop.permute.xlu0 %786  ;;  %v341_v36 = vpop.permute.xlu1 %340 }
  0x9d   :  { %v953_v38 = vsel %vm951_vm8, %v936_v37, %v787_v35  ;;  %v471_v39 = vpop.permute.xlu2 %470  ;;  %v835_v44 = vsel %vm832_vm1, %v2553_v40, %v341_v36  ;;  %v2577_v35 = vld [vmem:[%s4426_s0 + $0x211] ss:$2 sm:$0xff] }
  0x9e   :  { %2697 = vmatmul.msk.f32.gmra.mxu0 %vm977_vm9, %v953_v38  ;;  %v852_v47 = vsel %vm849_vm2, %v835_v44, %v405_v11  ;;  %v2625_v44 = vld [vmem:[%s4426_s0 + $0x229] ss:$2 sm:$0xff] }
  0xa2   :  { %606 = vrot.lane.b32.xlu0 %v2638_v41, %s2828_s17  ;;  %670 = vrot.lane.b32.xlu1 %v2654_v42, %s2831_s26  ;;  %v2593_v42 = vld [vmem:[%s4426_s0 + $0x212] ss:$2 sm:$0xff] }
  0xa3   :  { %734 = vrot.lane.b32.xlu2 %v2670_v43, %s2832_s12  ;;  %v2609_v43 = vld [vmem:[%s4426_s0 + $0x228] ss:$2 sm:$0xff] }
  0xa4   :  { %v469_v45 = vpop.permute.xlu0 %468  ;;  %v533_v46 = vpop.permute.xlu1 %532 }
  0xa5   :  { %v663_v48 = vpop.permute.xlu2 %662  ;;  %v869_v49 = vsel %vm866_vm3, %v852_v47, %v469_v45 }
  0xa6   :  { %v886_v53 = vsel %vm883_vm4, %v869_v49, %v533_v46 }
  0xa7   :  { %v903_v55 = vsel %vm900_vm5, %v886_v53, %v597_v20  ;;  %v2657_v53 = vld [vmem:[%s4426_s0 + $0x240] ss:$2 sm:$0xff] }
  0xaa   :  { %798 = vrot.lane.b32.xlu0 %v2686_v50, %s2833_s15  ;;  %352 = vrot.lane.b32.xlu1 %v2575_v51, %s2826_s13  ;;  %v2556_v51 = vld [vmem:[%s4426_s0 + $0xf0] ss:$2 sm:$0xff] }
  0xab   :  { %416 = vrot.lane.b32.xlu2 %v2591_v52, %s2829_s24  ;;  %v2641_v52 = vld [vmem:[%s4426_s0 + $0x22a] ss:$2 sm:$0xff] }
  0xac   :  { %v661_v54 = vpop.permute.xlu0 %660  ;;  %v725_v56 = vpop.permute.xlu1 %724 }
  0xad   :  { %v920_v57 = vsel %vm917_vm6, %v903_v55, %v661_v54  ;;  %v345_v58 = vpop.permute.xlu2 %344  ;;  %v2673_v54 = vld [vmem:[%s4426_s0 + $0x241] ss:$2 sm:$0xff] }
  0xae   :  { %v937_v59 = vsel %vm934_vm7, %v920_v57, %v725_v56  ;;  %v837_v28 = vsel %vm832_vm1, %v2555_v27, %v345_v58  ;;  %v2579_v27 = vld [vmem:[%s4426_s0 + $0x271] ss:$2 sm:$0xff] }
  0xaf   :  { %v954_v60 = vsel %vm951_vm8, %v937_v59, %v789_v29 }
  0xb0   :  { %2698 = vmatmul.msk.f32.gmra.mxu0 %vm977_vm9, %v954_v60 }
  0xb2   :  { %480 = vrot.lane.b32.xlu0 %v2607_v61, %s2827_s14  ;;  %544 = vrot.lane.b32.xlu1 %v2623_v62, %s2830_s25  ;;  %v2689_v61 = vld [vmem:[%s4426_s0 + $0x242] ss:$2 sm:$0xff]  ;;  %v2578_v62 = vld [vmem:[%s4426_s0 + $0x241] ss:$2 sm:$0xff] }
  0xb3   :  { %608 = vrot.lane.b32.xlu2 %v2639_v63, %s2828_s17  ;;  %v2594_v63 = vld [vmem:[%s4426_s0 + $0x242] ss:$2 sm:$0xff] }
  0xb4   :  { %v343_v0 = vpop.permute.xlu0 %342  ;;  %v407_v2 = vpop.permute.xlu1 %406 }
  0xb5   :  { %v537_v3 = vpop.permute.xlu2 %536  ;;  %v836_v4 = vsel %vm832_vm1, %v2554_v1, %v343_v0  ;;  %v2834_v0 = vmov 0.0  }
  0xb6   :  { %v853_v8 = vsel %vm849_vm2, %v836_v4, %v407_v2  ;;  %1111 = vst.msk [vmem:[#allocation2] sm:$0xff] %vm951_vm8, %v2834_v0 }
  0xb7   :  { %v870_v11 = vsel %vm866_vm3, %v853_v8, %v471_v39  ;;  %1113 = vst.msk [vmem:[#allocation2 + $0x8] sm:$0x3] %vm1112_vm10, %v2834_v0  ;;  %v2610_v8 = vld [vmem:[%s4426_s0 + $0x258] ss:$2 sm:$0xff] }
  0xb8   :  { %1114 = vst.msk [vmem:[#allocation2 + $0x10] sm:$0xff] %vm951_vm8, %v2834_v0 }
  0xb9   :  { %1115 = vst.msk [vmem:[#allocation2 + $0x18] sm:$0x3] %vm1112_vm10, %v2834_v0 }
  0xba   :  { %672 = vrot.lane.b32.xlu0 %v2655_v5, %s2831_s26  ;;  %736 = vrot.lane.b32.xlu1 %v2671_v6, %s2832_s12  ;;  %1116 = vst.msk [vmem:[#allocation2 + $0x20] sm:$0xff] %vm951_vm8, %v2834_v0 }
  0xbb   :  { %800 = vrot.lane.b32.xlu2 %v2687_v7, %s2833_s15  ;;  %1117 = vst.msk [vmem:[#allocation2 + $0x28] sm:$0x3] %vm1112_vm10, %v2834_v0 }
  0xbc   :  { %v535_v9 = vpop.permute.xlu0 %534  ;;  %v599_v10 = vpop.permute.xlu1 %598  ;;  %1118 = vst.msk [vmem:[#allocation2 + $0x30] sm:$0xff] %vm951_vm8, %v2834_v0 }
  0xbd   :  { %v729_v12 = vpop.permute.xlu2 %728  ;;  %v887_v13 = vsel %vm883_vm4, %v870_v11, %v535_v9  ;;  %v1169_v11 = vld [vmem:[#allocation2] ss:$2 sm:$0xf]  ;;  %1119 = vst.msk [vmem:[#allocation2 + $0x38] sm:$0x3] %vm1112_vm10, %v2834_v0 }
  0xbe   :  { %v904_v17 = vsel %vm900_vm5, %v887_v13, %v599_v10  ;;  %v2626_v10 = vld [vmem:[%s4426_s0 + $0x259] ss:$2 sm:$0xff]  ;;  %1319 = vst [vmem:[#allocation1] ss:$2 sm:$0xff] %v1169_v11 }
  0xbf   :  { %v921_v19 = vsel %vm917_vm6, %v904_v17, %v663_v48  ;;  %1120 = vst.msk [vmem:[#allocation2 + $0x40] sm:$0xff] %vm951_vm8, %v2834_v0  ;;  %v2676_v11 = vld [vmem:[%s4426_s0 + $0x2d1] ss:$2 sm:$0xff] }
  0xc0   :  { %1121 = vst.msk [vmem:[#allocation2 + $0x48] sm:$0x3] %vm1112_vm10, %v2834_v0 }
  0xc1   :  { %1122 = vst.msk [vmem:[#allocation2 + $0x50] sm:$0xff] %vm951_vm8, %v2834_v0 }
  0xc2   :  { %354 = vrot.lane.b32.xlu0 %v2576_v14, %s2826_s13  ;;  %418 = vrot.lane.b32.xlu1 %v2592_v15, %s2829_s24  ;;  %v2557_v14 = vld [vmem:[%s4426_s0 + $0x120] ss:$2 sm:$0xff]  ;;  %1123 = vst.msk [vmem:[#allocation2 + $0x58] sm:$0x3] %vm1112_vm10, %v2834_v0 }
  0xc3   :  { %482 = vrot.lane.b32.xlu2 %v2608_v16, %s2827_s14  ;;  %1124 = vst.msk [vmem:[#allocation2 + $0x60] sm:$0xff] %vm951_vm8, %v2834_v0 }
  0xc4   :  { %v727_v18 = vpop.permute.xlu0 %726  ;;  %v791_v20 = vpop.permute.xlu1 %790  ;;  %1125 = vst.msk [vmem:[#allocation2 + $0x68] sm:$0x3] %vm1112_vm10, %v2834_v0 }
  0xc5   :  { %v938_v21 = vsel %vm934_vm7, %v921_v19, %v727_v18  ;;  %v411_v22 = vpop.permute.xlu2 %410  ;;  %v2658_v18 = vld [vmem:[%s4426_s0 + $0x270] ss:$2 sm:$0xff]  ;;  %v2674_v19 = vld [vmem:[%s4426_s0 + $0x271] ss:$2 sm:$0xff]  ;;  %1126 = vst.msk [vmem:[#allocation2 + $0x70] sm:$0xff] %vm951_vm8, %v2834_v0 }
  0xc6   :  { %v955_v23 = vsel %vm951_vm8, %v938_v21, %v791_v20  ;;  %v2690_v20 = vld [vmem:[%s4426_s0 + $0x272] ss:$2 sm:$0xff]  ;;  %1127 = vst.msk [vmem:[#allocation2 + $0x78] sm:$0x3] %vm1112_vm10, %v2834_v0 }
  0xc7   :  { %2699 = vmatmul.msk.f32.gmra.mxu0 %vm977_vm9, %v955_v23  ;;  %1128 = vst.msk [vmem:[#allocation2 + $0x80] sm:$0xff] %vm951_vm8, %v2834_v0 }
  0xc8   :  { %1129 = vst.msk [vmem:[#allocation2 + $0x88] sm:$0x3] %vm1112_vm10, %v2834_v0 }
  0xc9   :  { %1132 = vst.msk [vmem:[#allocation2 + $0xa0] sm:$0xff] %vm951_vm8, %v2834_v0 }
  0xca   :  { %546 = vrot.lane.b32.xlu0 %v2624_v24, %s2830_s25  ;;  %610 = vrot.lane.b32.xlu1 %v2640_v25, %s2828_s17  ;;  %1133 = vst.msk [vmem:[#allocation2 + $0xa8] sm:$0x3] %vm1112_vm10, %v2834_v0 }
  0xcb   :  { %674 = vrot.lane.b32.xlu2 %v2656_v26, %s2831_s26  ;;  %1134 = vst.msk [vmem:[#allocation2 + $0xb0] sm:$0xff] %vm951_vm8, %v2834_v0 }
  0xcc   :  { %v409_v29 = vpop.permute.xlu0 %408  ;;  %v473_v30 = vpop.permute.xlu1 %472  ;;  %1135 = vst.msk [vmem:[#allocation2 + $0xb8] sm:$0x3] %vm1112_vm10, %v2834_v0 }
  0xcd   :  { %v603_v31 = vpop.permute.xlu2 %602  ;;  %v854_v32 = vsel %vm849_vm2, %v837_v28, %v409_v29  ;;  %v2595_v28 = vld [vmem:[%s4426_s0 + $0x272] ss:$2 sm:$0xff]  ;;  %1136 = vst.msk [vmem:[#allocation2 + $0xc0] sm:$0xff] %vm951_vm8, %v2834_v0 }
  0xce   :  { %v871_v36 = vsel %vm866_vm3, %v854_v32, %v473_v30  ;;  %v2611_v29 = vld [vmem:[%s4426_s0 + $0x288] ss:$2 sm:$0xff]  ;;  %1137 = vst.msk [vmem:[#allocation2 + $0xc8] sm:$0x3] %vm1112_vm10, %v2834_v0 }
  0xcf   :  { %v888_v39 = vsel %vm883_vm4, %v871_v36, %v537_v3  ;;  %1138 = vst.msk [vmem:[#allocation2 + $0xd0] sm:$0xff] %vm951_vm8, %v2834_v0 }
  0xd0   :  { %1139 = vst.msk [vmem:[#allocation2 + $0xd8] sm:$0x3] %vm1112_vm10, %v2834_v0 }
  0xd1   :  { %1140 = vst.msk [vmem:[#allocation2 + $0xe0] sm:$0xff] %vm951_vm8, %v2834_v0 }
  0xd2   :  { %738 = vrot.lane.b32.xlu0 %v2672_v33, %s2832_s12  ;;  %802 = vrot.lane.b32.xlu1 %v2688_v34, %s2833_s15  ;;  %1141 = vst.msk [vmem:[#allocation2 + $0xe8] sm:$0x3] %vm1112_vm10, %v2834_v0 }
  0xd3   :  { %356 = vrot.lane.b32.xlu2 %v2577_v35, %s2826_s13  ;;  %1142 = vst.msk [vmem:[#allocation2 + $0xf0] sm:$0xff] %vm951_vm8, %v2834_v0 }
  0xd4   :  { %v601_v37 = vpop.permute.xlu0 %600  ;;  %v665_v38 = vpop.permute.xlu1 %664  ;;  %1143 = vst.msk [vmem:[#allocation2 + $0xf8] sm:$0x3] %vm1112_vm10, %v2834_v0 }
  0xd5   :  { %v795_v40 = vpop.permute.xlu2 %794  ;;  %v905_v41 = vsel %vm900_vm5, %v888_v39, %v601_v37  ;;  %1144 = vst.msk [vmem:[#allocation2 + $0x100] sm:$0xff] %vm951_vm8, %v2834_v0 }
  0xd6   :  { %v922_v45 = vsel %vm917_vm6, %v905_v41, %v665_v38  ;;  %1145 = vst.msk [vmem:[#allocation2 + $0x108] sm:$0x3] %vm1112_vm10, %v2834_v0 }
  0xd7   :  { %v939_v48 = vsel %vm934_vm7, %v922_v45, %v729_v12  ;;  %v2642_v12 = vld [vmem:[%s4426_s0 + $0x25a] ss:$2 sm:$0xff]  ;;  %1146 = vst.msk [vmem:[#allocation2 + $0x110] sm:$0xff] %vm951_vm8, %v2834_v0 }
  0xd8   :  { %1147 = vst.msk [vmem:[#allocation2 + $0x118] sm:$0x3] %vm1112_vm10, %v2834_v0 }
  0xd9   :  { %1148 = vst.msk [vmem:[#allocation2 + $0x120] sm:$0xff] %vm951_vm8, %v2834_v0 }
  0xda   :  { %420 = vrot.lane.b32.xlu0 %v2593_v42, %s2829_s24  ;;  %484 = vrot.lane.b32.xlu1 %v2609_v43, %s2827_s14  ;;  %v2643_v42 = vld [vmem:[%s4426_s0 + $0x28a] ss:$2 sm:$0xff]  ;;  %1149 = vst.msk [vmem:[#allocation2 + $0x128] sm:$0x3] %vm1112_vm10, %v2834_v0 }
  0xdb   :  { %548 = vrot.lane.b32.xlu2 %v2625_v44, %s2830_s25  ;;  %v2659_v43 = vld [vmem:[%s4426_s0 + $0x2a0] ss:$2 sm:$0xff]  ;;  %v2558_v44 = vld [vmem:[%s4426_s0 + $0x150] ss:$2 sm:$0xff]  ;;  %1800 = vst.msk [vmem:[#allocation3] sm:$0x3f] %vm1799_vm13, %v2834_v0 }
  0xdc   :  { %v793_v46 = vpop.permute.xlu0 %792  ;;  %v347_v47 = vpop.permute.xlu1 %346  ;;  %1801 = vst.msk [vmem:[#allocation3 + $0x8] sm:$0x3f] %vm1799_vm13, %v2834_v0 }
  0xdd   :  { %v956_v49 = vsel %vm951_vm8, %v939_v48, %v793_v46  ;;  %v3302_v50 = vpop.permute.xlu2 %476  ;;  %v838_v55 = vsel %vm832_vm1, %v2556_v51, %v347_v47  ;;  %v2691_v51 = vld [vmem:[%s4426_s0 + $0x2a2] ss:$2 sm:$0xff]  ;;  %1802 = vst.msk [vmem:[#allocation3 + $0x10] sm:$0x3f] %vm1799_vm13, %v2834_v0 }
  0xde   :  { %2700 = vmatmul.msk.f32.gmra.mxu0 %vm977_vm9, %v956_v49  ;;  %v855_v58 = vsel %vm849_vm2, %v838_v55, %v411_v22  ;;  %1806 = vst.msk [vmem:[#allocation3 + $0x30] sm:$0x3f] %vm1799_vm13, %v2834_v0 }
  0xdf   :  { %1803 = vst.msk [vmem:[#allocation3 + $0x18] sm:$0x3f] %vm1799_vm13, %v2834_v0 }
  0xe0   :  { %1804 = vst.msk [vmem:[#allocation3 + $0x20] sm:$0x3f] %vm1799_vm13, %v2834_v0 }
  0xe1   :  { %1807 = vst.msk [vmem:[#allocation3 + $0x38] sm:$0x3f] %vm1799_vm13, %v2834_v0 }
  0xe2   :  { %612 = vrot.lane.b32.xlu0 %v2641_v52, %s2828_s17  ;;  %676 = vrot.lane.b32.xlu1 %v2657_v53, %s2831_s26  ;;  %v2580_v52 = vld [vmem:[%s4426_s0 + $0x2a1] ss:$2 sm:$0xff]  ;;  %1808 = vst.msk [vmem:[#allocation3 + $0x40] sm:$0x3f] %vm1799_vm13, %v2834_v0 }
  0xe3   :  { %740 = vrot.lane.b32.xlu2 %v2673_v54, %s2832_s12  ;;  %1809 = vst.msk [vmem:[#allocation3 + $0x48] sm:$0x3f] %vm1799_vm13, %v2834_v0 }
  0xe4   :  { %v475_v56 = vpop.permute.xlu0 %474  ;;  %v539_v57 = vpop.permute.xlu1 %538  ;;  %1810 = vst.msk [vmem:[#allocation3 + $0x50] sm:$0x3f] %vm1799_vm13, %v2834_v0 }
  0xe5   :  { %v3322_v59 = vpop.permute.xlu2 %668  ;;  %v872_v60 = vsel %vm866_vm3, %v855_v58, %v475_v56 }
  0xe6   :  { %v889_v1 = vsel %vm883_vm4, %v872_v60, %v539_v57  ;;  %v2612_v60 = vld [vmem:[%s4426_s0 + $0x2b8] ss:$2 sm:$0xff] }
  0xe7   :  { %v906_v3 = vsel %vm900_vm5, %v889_v1, %v603_v31  ;;  %v3436_v31 = vld [vmem:[%s4428_s2] ss:$0 sm:$0xff] }
  0xea   :  { %804 = vrot.lane.b32.xlu0 %v2689_v61, %s2833_s15  ;;  %358 = vrot.lane.b32.xlu1 %v2578_v62, %s2826_s13  ;;  %v2628_v61 = vld [vmem:[%s4426_s0 + $0x2b9] ss:$2 sm:$0xff] }
  0xeb   :  { %422 = vrot.lane.b32.xlu2 %v2594_v63, %s2829_s24 }
  0xec   :  { %v667_v2 = vpop.permute.xlu0 %666  ;;  %v731_v4 = vpop.permute.xlu1 %730 }
  0xed   :  { %v923_v5 = vsel %vm917_vm6, %v906_v3, %v667_v2  ;;  %v3350_v6 = vpop.permute.xlu2 %350 }
  0xee   :  { %v940_v7 = vsel %vm934_vm7, %v923_v5, %v731_v4  ;;  %v840_v45 = vsel %vm832_vm1, %v2558_v44, %v3350_v6 }
  0xef   :  { %v957_v9 = vsel %vm951_vm8, %v940_v7, %v795_v40  ;;  %v2627_v40 = vld [vmem:[%s4426_s0 + $0x289] ss:$2 sm:$0xff] }
  0xf0   :  { %2701 = vmatmul.msk.f32.gmra.mxu0 %vm977_vm9, %v957_v9  ;;  %v2644_v9 = vld [vmem:[%s4426_s0 + $0x2ba] ss:$2 sm:$0xff] }
  0xf2   :  { %486 = vrot.lane.b32.xlu0 %v2610_v8, %s2827_s14  ;;  %550 = vrot.lane.b32.xlu1 %v2626_v10, %s2830_s25  ;;  %v2559_v8 = vld [vmem:[%s4426_s0 + $0x1b0] ss:$2 sm:$0xff] }
  0xf3   :  { %614 = vrot.lane.b32.xlu2 %v2642_v12, %s2828_s17  ;;  %v2660_v10 = vld [vmem:[%s4426_s0 + $0x2d0] ss:$2 sm:$0xff] }
  0xf4   :  { %v349_v13 = vpop.permute.xlu0 %348  ;;  %v413_v15 = vpop.permute.xlu1 %412 }
  0xf5   :  { %v3382_v16 = vpop.permute.xlu2 %542  ;;  %v839_v17 = vsel %vm832_vm1, %v2557_v14, %v349_v13 }
  0xf6   :  { %v856_v21 = vsel %vm849_vm2, %v839_v17, %v413_v15 }
  0xf7   :  { %v873_v24 = vsel %vm866_vm3, %v856_v21, %v3302_v50  ;;  %v2675_v50 = vld [vmem:[%s4426_s0 + $0x2a1] ss:$2 sm:$0xff]  ;;  %v2597_v21 = vld [vmem:[%s4426_s0 + $0x2d2] ss:$2 sm:$0xff] }
  0xfa   :  { %678 = vrot.lane.b32.xlu0 %v2658_v18, %s2831_s26  ;;  %742 = vrot.lane.b32.xlu1 %v2674_v19, %s2832_s12  ;;  %v2692_v18 = vld [vmem:[%s4426_s0 + $0x2d2] ss:$2 sm:$0xff] }
  0xfb   :  { %806 = vrot.lane.b32.xlu2 %v2690_v20, %s2833_s15  ;;  %v2581_v20 = vld [vmem:[%s4426_s0 + $0x2d1] ss:$2 sm:$0xff] }
  0xfc   :  { %v541_v22 = vpop.permute.xlu0 %540  ;;  %v605_v23 = vpop.permute.xlu1 %604 }
  0xfd   :  { %v3414_v25 = vpop.permute.xlu2 %734  ;;  %v890_v26 = vsel %vm883_vm4, %v873_v24, %v541_v22 }
  0xfe   :  { %v907_v30 = vsel %vm900_vm5, %v890_v26, %v605_v23 }
  0xff   :  { %v924_v33 = vsel %vm917_vm6, %v907_v30, %v3322_v59  ;;  %v2596_v59 = vld [vmem:[%s4426_s0 + $0x2a2] ss:$2 sm:$0xff] }
 0x102   :  { %360 = vrot.lane.b32.xlu0 %v2579_v27, %s2826_s13  ;;  %424 = vrot.lane.b32.xlu1 %v2595_v28, %s2829_s24  ;;  %v1185_v28 = vld [vmem:[#allocation2 + $0x1] ss:$2 sm:$0xf] }
 0x103   :  { %488 = vrot.lane.b32.xlu2 %v2611_v29, %s2827_s14 }
 0x104   :  { %v733_v32 = vpop.permute.xlu0 %732  ;;  %v1047_v34 = vpop.f32.mrf.mxu0 }
 0x105   :  { %v941_v35 = vsel %vm934_vm7, %v924_v33, %v733_v32  ;;  %v1048_v36 = vadd.f32 %v3436_v31, %v1047_v34  ;;  %v797_v37 = vpop.permute.xlu1 %796  ;;  %v3455_v38 = vpop.permute.xlu2 %416  ;;  %v2613_v34 = vld [vmem:[%s4426_s0 + $0x2e8] ss:$2 sm:$0xff] }
 0x106   :  { %v958_v39 = vsel %vm951_vm8, %v941_v35, %v797_v37  ;;  %v2629_v35 = vld [vmem:[%s4426_s0 + $0x2e9] ss:$2 sm:$0xff]  ;;  %v2645_v37 = vld [vmem:[%s4426_s0 + $0x2ea] ss:$2 sm:$0xff] }
 0x107   :  { %v1095_v41 = vmax.f32 %v1048_v36, 0.0  ;;  %2702 = vmatmul.msk.f32.gmra.mxu0 %vm977_vm9, %v958_v39 }
 0x109   :  { %1153 = vst.msk [vmem:[#allocation2 + $0x11] sm:$0xff] %vm951_vm8, %v1095_v41  ;;  %v2560_v41 = vld [vmem:[%s4426_s0 + $0x1e0] ss:$2 sm:$0xff] }
 0x10a   :  { %552 = vrot.lane.b32.xlu0 %v2627_v40, %s2830_s25  ;;  %616 = vrot.lane.b32.xlu1 %v2643_v42, %s2828_s17 }
 0x10b   :  { %680 = vrot.lane.b32.xlu2 %v2659_v43, %s2831_s26 }
 0x10c   :  { %v415_v46 = vpop.permute.xlu0 %414 }
 0x10d   :  { %v479_v47 = vpop.permute.xlu1 %478  ;;  %v609_v48 = vpop.permute.xlu2 %608  ;;  %v857_v49 = vsel %vm849_vm2, %v840_v45, %v415_v46  ;;  %v2661_v45 = vld [vmem:[%s4426_s0 + $0x300] ss:$2 sm:$0xff]  ;;  %v2677_v46 = vld [vmem:[%s4426_s0 + $0x301] ss:$2 sm:$0xff] }
 0x10e   :  { %v874_v53 = vsel %vm866_vm3, %v857_v49, %v479_v47  ;;  %v1201_v47 = vld [vmem:[#allocation2 + $0x2] ss:$2 sm:$0xf] }
 0x10f   :  { %v891_v55 = vsel %vm883_vm4, %v874_v53, %v3382_v16 }
 0x112   :  { %744 = vrot.lane.b32.xlu0 %v2675_v50, %s2832_s12  ;;  %808 = vrot.lane.b32.xlu1 %v2691_v51, %s2833_s15 }
 0x113   :  { %362 = vrot.lane.b32.xlu2 %v2580_v52, %s2826_s13 }
 0x114   :  { %v607_v54 = vpop.permute.xlu0 %606 }
 0x115   :  { %v671_v56 = vpop.permute.xlu1 %670  ;;  %v801_v57 = vpop.permute.xlu2 %800  ;;  %v908_v58 = vsel %vm900_vm5, %v891_v55, %v607_v54 }
 0x116   :  { %v925_v62 = vsel %vm917_vm6, %v908_v58, %v671_v56  ;;  %v2582_v56 = vld [vmem:[%s4426_s0 + $0x301] ss:$2 sm:$0xff] }
 0x117   :  { %v942_v3 = vsel %vm934_vm7, %v925_v62, %v3414_v25 }
 0x11a   :  { %426 = vrot.lane.b32.xlu0 %v2596_v59, %s2829_s24  ;;  %490 = vrot.lane.b32.xlu1 %v2612_v60, %s2827_s14  ;;  %v2614_v59 = vld [vmem:[%s4426_s0 + $0x318] ss:$2 sm:$0xff] }
 0x11b   :  { %v1050_v63 = vpop.f32.mrf.mxu0  ;;  %554 = vrot.lane.b32.xlu2 %v2628_v61, %s2830_s25  ;;  %v1216_v61 = vld [vmem:[#allocation2 + $0x10] ss:$2 sm:$0xf] }
 0x11c   :  { %v1051_v1 = vadd.f32 %v3436_v31, %v1050_v63  ;;  %v799_v2 = vpop.permute.xlu0 %798 }
 0x11d   :  { %v353_v4 = vpop.permute.xlu1 %352  ;;  %v959_v5 = vsel %vm951_vm8, %v942_v3, %v799_v2  ;;  %v3531_v6 = vpop.permute.xlu2 %482 }
 0x11e   :  { %v1096_v7 = vmax.f32 %v1051_v1, 0.0  ;;  %2703 = vmatmul.msk.f32.gmra.mxu0 %vm977_vm9, %v959_v5  ;;  %v841_v12 = vsel %vm832_vm1, %v2559_v8, %v353_v4 }
 0x11f   :  { %v858_v14 = vsel %vm849_vm2, %v841_v12, %v3455_v38  ;;  %v2561_v12 = vld [vmem:[%s4426_s0 + $0x210] ss:$2 sm:$0xff] }
 0x120   :  { %1154 = vst.msk [vmem:[#allocation2 + $0x21] sm:$0xff] %vm951_vm8, %v1096_v7 }
 0x122   :  { %618 = vrot.lane.b32.xlu0 %v2644_v9, %s2828_s17  ;;  %682 = vrot.lane.b32.xlu1 %v2660_v10, %s2831_s26  ;;  %v2630_v9 = vld [vmem:[%s4426_s0 + $0x319] ss:$2 sm:$0xff]  ;;  %v2646_v10 = vld [vmem:[%s4426_s0 + $0x31a] ss:$2 sm:$0xff] }
 0x123   :  { %746 = vrot.lane.b32.xlu2 %v2676_v11, %s2832_s12  ;;  %v2662_v11 = vld [vmem:[%s4426_s0 + $0x330] ss:$2 sm:$0xff] }
 0x124   :  { %v481_v13 = vpop.permute.xlu0 %480 }
 0x125   :  { %v545_v15 = vpop.permute.xlu1 %544  ;;  %v3553_v16 = vpop.permute.xlu2 %674  ;;  %v875_v17 = vsel %vm866_vm3, %v858_v14, %v481_v13  ;;  %v1232_v14 = vld [vmem:[#allocation2 + $0x11] ss:$2 sm:$0xf] }
 0x126   :  { %v892_v22 = vsel %vm883_vm4, %v875_v17, %v545_v15 }
 0x127   :  { %v1171_v19 = vld [vmem:[#allocation2 + $0x20] ss:$2 sm:$0xf]  ;;  %v909_v24 = vsel %vm900_vm5, %v892_v22, %v609_v48  ;;  %v1187_v39 = vld [vmem:[#allocation2 + $0x21] ss:$2 sm:$0xf] }
 0x128   :  { %1321 = vst [vmem:[#allocation1 + $0x1] ss:$2 sm:$0xff] %v1171_v19  ;;  %v2693_v48 = vld [vmem:[%s4426_s0 + $0x302] ss:$2 sm:$0xff]  ;;  %v2694_v22 = vld [vmem:[%s4426_s0 + $0x332] ss:$2 sm:$0xff] }
 0x129   :  { %v1203_v51 = vld [vmem:[#allocation2 + $0x22] ss:$2 sm:$0xf] }
 0x12a   :  { %810 = vrot.lane.b32.xlu0 %v2692_v18, %s2833_s15  ;;  %364 = vrot.lane.b32.xlu1 %v2581_v20, %s2826_s13 }
 0x12b   :  { %428 = vrot.lane.b32.xlu2 %v2597_v21, %s2829_s24  ;;  %v2678_v21 = vld [vmem:[%s4426_s0 + $0x331] ss:$2 sm:$0xff] }
 0x12c   :  { %v673_v23 = vpop.permute.xlu0 %672 }
 0x12d   :  { %v926_v25 = vsel %vm917_vm6, %v909_v24, %v673_v23  ;;  %v737_v26 = vpop.permute.xlu1 %736  ;;  %v1053_v27 = vpop.f32.mrf.mxu0 }
 0x12e   :  { %v943_v29 = vsel %vm934_vm7, %v926_v25, %v737_v26  ;;  %v1054_v30 = vadd.f32 %v3436_v31, %v1053_v27  ;;  %v3573_v32 = vpop.permute.xlu2 %356  ;;  %v1248_v27 = vld [vmem:[#allocation2 + $0x12] ss:$2 sm:$0xf] }
 0x12f   :  { %v960_v33 = vsel %vm951_vm8, %v943_v29, %v801_v57  ;;  %v3586_v38 = vld.sshfl [vmem:[#allocation1] sm:$0xff pattern:$0x75316420] }
 0x130   :  { %v1097_v36 = vmax.f32 %v1054_v30, 0.0  ;;  %2704 = vmatmul.msk.f32.gmra.mxu0 %vm977_vm9, %v960_v33  ;;  %1350 = vst [vmem:[#allocation1] ss:$2 sm:$0xff] %v1185_v28  ;;  %v2598_v57 = vld [vmem:[%s4426_s0 + $0x302] ss:$2 sm:$0xff] }
 0x131   :  { %1352 = vst [vmem:[#allocation1 + $0x1] ss:$2 sm:$0xff] %v1187_v39 }
 0x132   :  { %492 = vrot.lane.b32.xlu0 %v2613_v34, %s2827_s14  ;;  %556 = vrot.lane.b32.xlu1 %v2629_v35, %s2830_s25  ;;  %1155 = vst.msk [vmem:[#allocation2 + $0x31] sm:$0xff] %vm951_vm8, %v1097_v36 }
 0x133   :  { %620 = vrot.lane.b32.xlu2 %v2645_v37, %s2828_s17 }
 0x134   :  { %v355_v40 = vpop.permute.xlu0 %354 }
 0x135   :  { %v419_v42 = vpop.permute.xlu1 %418  ;;  %v842_v44 = vsel %vm832_vm1, %v2560_v41, %v355_v40  ;;  %v1264_v40 = vld [vmem:[#allocation2 + $0x20] ss:$2 sm:$0xf] }
 0x136   :  { %v3595_v43 = vpop.permute.xlu2 %548  ;;  %v859_v50 = vsel %vm849_vm2, %v842_v44, %v419_v42 }
 0x137   :  { %v876_v53 = vsel %vm866_vm3, %v859_v50, %v3531_v6 }
 0x138   :  { %v3607_v49 = vld.sshfl [vmem:[#allocation1] sm:$0xff pattern:$0x75316420] }
 0x139   :  { %1389 = vst [vmem:[#allocation1] ss:$2 sm:$0xff] %v1201_v47  ;;  %v1218_v63 = vld [vmem:[#allocation2 + $0x30] ss:$2 sm:$0xf] }
 0x13a   :  { %684 = vrot.lane.b32.xlu0 %v2661_v45, %s2831_s26  ;;  %748 = vrot.lane.b32.xlu1 %v2677_v46, %s2832_s12  ;;  %1391 = vst [vmem:[#allocation1 + $0x1] ss:$2 sm:$0xff] %v1203_v51  ;;  %v1234_v18 = vld [vmem:[#allocation2 + $0x31] ss:$2 sm:$0xf] }
 0x13b   :  { %812 = vrot.lane.b32.xlu2 %v2693_v48, %s2833_s15  ;;  %v2562_v46 = vld [vmem:[%s4426_s0 + $0x240] ss:$2 sm:$0xff] }
 0x13c   :  { %v547_v52 = vpop.permute.xlu0 %546 }
 0x13d   :  { %v611_v54 = vpop.permute.xlu1 %610  ;;  %v893_v55 = vsel %vm883_vm4, %v876_v53, %v547_v52 }
 0x13e   :  { %v741_v58 = vpop.permute.xlu2 %740  ;;  %v910_v60 = vsel %vm900_vm5, %v893_v55, %v611_v54  ;;  %v1280_v55 = vld [vmem:[#allocation2 + $0x21] ss:$2 sm:$0xf] }
 0x13f   :  { %v927_v2 = vsel %vm917_vm6, %v910_v60, %v3553_v16  ;;  %v843_v16 = vsel %vm832_vm1, %v2561_v12, %v3573_v32  ;;  %v1250_v32 = vld [vmem:[#allocation2 + $0x32] ss:$2 sm:$0xf] }
 0x140   :  { %v2563_v12 = vld [vmem:[%s4426_s0 + $0x270] ss:$2 sm:$0xff] }
 0x141   :  { %v3628_v62 = vld.sshfl [vmem:[#allocation1] sm:$0xff pattern:$0x75316420] }
 0x142   :  { %366 = vrot.lane.b32.xlu0 %v2582_v56, %s2826_s13  ;;  %430 = vrot.lane.b32.xlu1 %v2598_v57, %s2829_s24  ;;  %1428 = vst [vmem:[#allocation1] ss:$2 sm:$0xff] %v1216_v61 }
 0x143   :  { %494 = vrot.lane.b32.xlu2 %v2614_v59, %s2827_s14  ;;  %1430 = vst [vmem:[#allocation1 + $0x1] ss:$2 sm:$0xff] %v1218_v63 }
 0x144   :  { %v739_v1 = vpop.permute.xlu0 %738  ;;  %v1056_v3 = vpop.f32.mrf.mxu0 }
 0x145   :  { %v944_v4 = vsel %vm934_vm7, %v927_v2, %v739_v1  ;;  %v1057_v5 = vadd.f32 %v3436_v31, %v1056_v3  ;;  %v803_v6 = vpop.permute.xlu1 %802 }
 0x146   :  { %v961_v7 = vsel %vm951_vm8, %v944_v4, %v803_v6  ;;  %v423_v13 = vpop.permute.xlu2 %422 }
 0x147   :  { %v1098_v8 = vmax.f32 %v1057_v5, 0.0  ;;  %2705 = vmatmul.msk.f32.gmra.mxu0 %vm977_vm9, %v961_v7  ;;  %v1296_v5 = vld [vmem:[#allocation2 + $0x22] ss:$2 sm:$0xf] }
 0x149   :  { %1156 = vst.msk [vmem:[#allocation2 + $0x41] sm:$0xff] %vm951_vm8, %v1098_v8 }
 0x14a   :  { %558 = vrot.lane.b32.xlu0 %v2630_v9, %s2830_s25  ;;  %622 = vrot.lane.b32.xlu1 %v2646_v10, %s2828_s17  ;;  %v3653_v15 = vld.sshfl [vmem:[#allocation1] sm:$0xff pattern:$0x75316420] }
 0x14b   :  { %686 = vrot.lane.b32.xlu2 %v2662_v11, %s2831_s26  ;;  %1467 = vst [vmem:[#allocation1] ss:$2 sm:$0xff] %v1232_v14 }
 0x14c   :  { %v421_v17 = vpop.permute.xlu0 %420  ;;  %1469 = vst [vmem:[#allocation1 + $0x1] ss:$2 sm:$0xff] %v1234_v18 }
 0x14d   :  { %v485_v19 = vpop.permute.xlu1 %484  ;;  %v860_v20 = vsel %vm849_vm2, %v843_v16, %v421_v17 }
 0x14e   :  { %v877_v24 = vsel %vm866_vm3, %v860_v20, %v485_v19  ;;  %v615_v25 = vpop.permute.xlu2 %614 }
 0x14f   :  { %v894_v29 = vsel %vm883_vm4, %v877_v24, %v3595_v43 }
 0x150   :  { %v1173_v23 = vld [vmem:[#allocation2 + $0x40] ss:$2 sm:$0xf]  ;;  %v1282_v57 = vld [vmem:[#allocation2 + $0x41] ss:$2 sm:$0xf] }
 0x151   :  { %1323 = vst [vmem:[#allocation1 + $0x10] ss:$2 sm:$0xff] %v1173_v23  ;;  %v1266_v47 = vld [vmem:[#allocation2 + $0x40] ss:$2 sm:$0xf] }
 0x152   :  { %750 = vrot.lane.b32.xlu0 %v2678_v21, %s2832_s12  ;;  %814 = vrot.lane.b32.xlu1 %v2694_v22, %s2833_s15  ;;  %v1298_v8 = vld [vmem:[#allocation2 + $0x42] ss:$2 sm:$0xf]  ;;  %v1189_v23 = vld [vmem:[#allocation2 + $0x41] ss:$2 sm:$0xf] }
 0x153   :  { %v3667_v28 = vld.sshfl [vmem:[#allocation1] sm:$0xff pattern:$0x75316420] }
 0x154   :  { %v613_v26 = vpop.permute.xlu0 %612  ;;  %1498 = vst [vmem:[#allocation1] ss:$2 sm:$0xff] %v1248_v27 }
 0x155   :  { %v677_v30 = vpop.permute.xlu1 %676  ;;  %v911_v33 = vsel %vm900_vm5, %v894_v29, %v613_v26  ;;  %1500 = vst [vmem:[#allocation1 + $0x1] ss:$2 sm:$0xff] %v1250_v32 }
 0x156   :  { %v928_v34 = vsel %vm917_vm6, %v911_v33, %v677_v30  ;;  %v807_v45 = vpop.permute.xlu2 %806 }
 0x157   :  { %v945_v39 = vsel %vm934_vm7, %v928_v34, %v741_v58 }
 0x15b   :  { %v1059_v35 = vpop.f32.mrf.mxu0 }
 0x15c   :  { %v1060_v36 = vadd.f32 %v3436_v31, %v1059_v35  ;;  %v805_v37 = vpop.permute.xlu0 %804  ;;  %v1513_v44 = vld.sshfl [vmem:[#allocation1] sm:$0xff pattern:$0x75316420] }
 0x15d   :  { %v359_v41 = vpop.permute.xlu1 %358  ;;  %v962_v42 = vsel %vm951_vm8, %v945_v39, %v805_v37  ;;  %1537 = vst [vmem:[#allocation1] ss:$2 sm:$0xff] %v1264_v40  ;;  %v2735_v48 = vpack.i.bf16 %v3607_v49, %v1513_v44  ;;  %v2564_v37 = vld [vmem:[%s4426_s0 + $0x2a0] ss:$2 sm:$0xff] }
 0x15e   :  { %v1099_v43 = vmax.f32 %v1060_v36, 0.0  ;;  %2706 = vmatmul.msk.f32.gmra.mxu0 %vm977_vm9, %v962_v42  ;;  %1539 = vst [vmem:[#allocation1 + $0x1] ss:$2 sm:$0xff] %v1266_v47  ;;  %v844_v50 = vsel %vm832_vm1, %v2562_v46, %v359_v41  ;;  %v489_v49 = vpop.permute.xlu2 %488  ;;  %v1205_v41 = vld [vmem:[#allocation2 + $0x42] ss:$2 sm:$0xf] }
 0x15f   :  { %2736 = vrot.lane.b32.xlu2 %v2735_v48, %s2833_s15  ;;  %v861_v52 = vsel %vm849_vm2, %v844_v50, %v423_v13 }
 0x160   :  { %1157 = vst.msk [vmem:[#allocation2 + $0x51] sm:$0xff] %vm951_vm8, %v1099_v43 }
 0x164   :  { %v487_v51 = vpop.permute.xlu0 %486 }
 0x165   :  { %v551_v53 = vpop.permute.xlu1 %550  ;;  %v878_v54 = vsel %vm866_vm3, %v861_v52, %v487_v51  ;;  %v1552_v56 = vld.sshfl [vmem:[#allocation1] sm:$0xff pattern:$0x75316420] }
 0x166   :  { %1576 = vst [vmem:[#allocation1] ss:$2 sm:$0xff] %v1280_v55  ;;  %v2740_v58 = vpack.i.bf16 %v3628_v62, %v1552_v56  ;;  %v895_v59 = vsel %vm883_vm4, %v878_v54, %v551_v53  ;;  %v681_v10 = vpop.permute.xlu2 %680 }
 0x167   :  { %1578 = vst [vmem:[#allocation1 + $0x1] ss:$2 sm:$0xff] %v1282_v57  ;;  %v912_v61 = vsel %vm900_vm5, %v895_v59, %v615_v25  ;;  %v1220_v53 = vld [vmem:[#allocation2 + $0x50] ss:$2 sm:$0xf] }
 0x168   :  { %2741 = vrot.lane.b32.xlu0 %v2740_v58, %s2835_s23 }
 0x16c   :  { %v679_v60 = vpop.permute.xlu0 %678 }
 0x16d   :  { %v929_v63 = vsel %vm917_vm6, %v912_v61, %v679_v60  ;;  %v743_v1 = vpop.permute.xlu1 %742  ;;  %v1062_v2 = vpop.f32.mrf.mxu0 }
 0x16e   :  { %v946_v3 = vsel %vm934_vm7, %v929_v63, %v743_v1  ;;  %v1063_v4 = vadd.f32 %v3436_v31, %v1062_v2  ;;  %v1591_v6 = vld.sshfl [vmem:[#allocation1] sm:$0xff pattern:$0x75316420]  ;;  %v363_v18 = vpop.permute.xlu2 %362  ;;  %v1236_v1 = vld [vmem:[#allocation2 + $0x51] ss:$2 sm:$0xf] }
 0x16f   :  { %v963_v62 = vsel %vm951_vm8, %v946_v3, %v807_v45  ;;  %1615 = vst [vmem:[#allocation1] ss:$2 sm:$0xff] %v1296_v5  ;;  %v2745_v9 = vpack.i.bf16 %v3653_v15, %v1591_v6  ;;  %v846_v39 = vsel %vm832_vm1, %v2564_v37, %v363_v18 }
 0x170   :  { %v1100_v7 = vmax.f32 %v1063_v4, 0.0  ;;  %2707 = vmatmul.msk.f32.gmra.mxu0 %vm977_vm9, %v963_v62  ;;  %1617 = vst [vmem:[#allocation1 + $0x1] ss:$2 sm:$0xff] %v1298_v8  ;;  %v2565_v4 = vld [vmem:[%s4426_s0 + $0x2d0] ss:$2 sm:$0xff] }
 0x171   :  { %2746 = vrot.lane.b32.xlu1 %v2745_v9, %s2836_s27 }
 0x172   :  { %1158 = vst.msk [vmem:[#allocation2 + $0x61] sm:$0xff] %vm951_vm8, %v1100_v7 }
 0x174   :  { %v361_v11 = vpop.permute.xlu0 %360 }
 0x175   :  { %v425_v13 = vpop.permute.xlu1 %424  ;;  %v845_v14 = vsel %vm832_vm1, %v2563_v12, %v361_v11  ;;  %v1252_v11 = vld [vmem:[#allocation2 + $0x52] ss:$2 sm:$0xf] }
 0x176   :  { %v862_v17 = vsel %vm849_vm2, %v845_v14, %v425_v13  ;;  %v555_v34 = vpop.permute.xlu2 %554 }
 0x177   :  { %v879_v19 = vsel %vm866_vm3, %v862_v17, %v489_v49  ;;  %v1691_v17 = vld [vmem:[%s4429_s3 + $0xf8] sm:$0xff] }
 0x178   :  { %1737 = vmatpush.msra.mxu2 %v1691_v17 }
 0x179   :  { %v1175_v16 = vld [vmem:[#allocation2 + $0x60] ss:$2 sm:$0xf]  ;;  %v1191_v29 = vld [vmem:[#allocation2 + $0x61] ss:$2 sm:$0xf] }
 0x17a   :  { %1325 = vst [vmem:[#allocation1 + $0x11] ss:$2 sm:$0xff] %v1175_v16  ;;  %v1207_v43 = vld [vmem:[#allocation2 + $0x62] ss:$2 sm:$0xf]  ;;  %v1675_v16 = vld [vmem:[%s4429_s3 + $0x78] sm:$0xff] }
 0x17b   :  { %1708 = vmatpush.msra.mxu1 %v1675_v16  ;;  %v1680_v16 = vld [vmem:[%s4429_s3 + $0xa0] sm:$0xff]  ;;  %v1300_v17 = vld [vmem:[#allocation2 + $0x62] ss:$2 sm:$0xf] }
 0x17c   :  { %v553_v15 = vpop.permute.xlu0 %552 }
 0x17d   :  { %v617_v20 = vpop.permute.xlu1 %616  ;;  %v896_v21 = vsel %vm883_vm4, %v879_v19, %v553_v15  ;;  %v1674_v19 = vld [vmem:[%s4429_s3 + $0x70] sm:$0xff] }
 0x17e   :  { %v913_v22 = vsel %vm900_vm5, %v896_v21, %v617_v20  ;;  %v747_v46 = vpop.permute.xlu2 %746  ;;  %v1690_v20 = vld [vmem:[%s4429_s3 + $0xf0] sm:$0xff]  ;;  %v1177_v21 = vld [vmem:[#allocation2 + $0xa0] ss:$2 sm:$0xf]  ;;  %1709 = vmatpush.msra.mxu1 %v1674_v19  ;;  %v1663_v19 = vld [vmem:[%s4429_s3 + $0x18] sm:$0xff] }
 0x17f   :  { %v930_v26 = vsel %vm917_vm6, %v913_v22, %v681_v10  ;;  %1327 = vst [vmem:[#allocation1 + $0x20] ss:$2 sm:$0xff] %v1177_v21  ;;  %1738 = vmatpush.msra.mxu2 %v1690_v20  ;;  %v1679_v20 = vld [vmem:[%s4429_s3 + $0x98] sm:$0xff] }
 0x181   :  { %v3706_v24 = vld.sshfl [vmem:[#allocation1 + $0x10] sm:$0xff pattern:$0x75316420] }
 0x182   :  { %1354 = vst [vmem:[#allocation1 + $0x10] ss:$2 sm:$0xff] %v1189_v23 }
 0x183   :  { %1356 = vst [vmem:[#allocation1 + $0x11] ss:$2 sm:$0xff] %v1191_v29 }
 0x184   :  { %v745_v25 = vpop.permute.xlu0 %744  ;;  %v1065_v27 = vpop.f32.mrf.mxu0 }
 0x185   :  { %v947_v30 = vsel %vm934_vm7, %v930_v26, %v745_v25  ;;  %v1066_v32 = vadd.f32 %v3436_v31, %v1065_v27  ;;  %v809_v33 = vpop.permute.xlu1 %808 }
 0x186   :  { %v964_v35 = vsel %vm951_vm8, %v947_v30, %v809_v33  ;;  %v429_v57 = vpop.permute.xlu2 %428  ;;  %v1689_v33 = vld [vmem:[%s4429_s3 + $0xe8] sm:$0xff] }
 0x187   :  { %v1101_v36 = vmax.f32 %v1066_v32, 0.0  ;;  %2708 = vmatmul.msk.f32.gmra.mxu0 %vm977_vm9, %v964_v35  ;;  %v1673_v32 = vld [vmem:[%s4429_s3 + $0x68] sm:$0xff]  ;;  %1739 = vmatpush.msra.mxu2 %v1689_v33 }
 0x188   :  { %1710 = vmatpush.msra.mxu1 %v1673_v32  ;;  %v1662_v32 = vld [vmem:[%s4429_s3 + $0x10] sm:$0xff] }
 0x189   :  { %1159 = vst.msk [vmem:[#allocation2 + $0x71] sm:$0xff] %vm951_vm8, %v1101_v36 }
 0x18a   :  { %v3718_v42 = vld.sshfl [vmem:[#allocation1 + $0x10] sm:$0xff pattern:$0x75316420] }
 0x18b   :  { %1393 = vst [vmem:[#allocation1 + $0x10] ss:$2 sm:$0xff] %v1205_v41  ;;  %v1688_v41 = vld [vmem:[%s4429_s3 + $0xe0] sm:$0xff] }
 0x18c   :  { %v427_v40 = vpop.permute.xlu0 %426  ;;  %1395 = vst [vmem:[#allocation1 + $0x11] ss:$2 sm:$0xff] %v1207_v43  ;;  %1740 = vmatpush.msra.mxu2 %v1688_v41  ;;  %v1671_v43 = vld [vmem:[%s4429_s3 + $0x58] sm:$0xff] }
 0x18d   :  { %v491_v44 = vpop.permute.xlu1 %490  ;;  %v863_v45 = vsel %vm849_vm2, %v846_v39, %v427_v40  ;;  %v1672_v40 = vld [vmem:[%s4429_s3 + $0x60] sm:$0xff] }
 0x18e   :  { %v880_v47 = vsel %vm866_vm3, %v863_v45, %v491_v44  ;;  %v621_v6 = vpop.permute.xlu2 %620  ;;  %v1695_v44 = vld [vmem:[%s4429_s3 + $0x118] sm:$0xff]  ;;  %1711 = vmatpush.msra.mxu1 %v1672_v40  ;;  %v1630_v40 = vld.sshfl [vmem:[#allocation1] sm:$0xff pattern:$0x75316420] }
 0x18f   :  { %v897_v51 = vsel %vm883_vm4, %v880_v47, %v555_v34  ;;  %v1268_v34 = vld [vmem:[#allocation2 + $0x60] ss:$2 sm:$0xf]  ;;  %1778 = vmatpush.msrb.mxu3 %v1695_v44  ;;  %v1694_v47 = vld [vmem:[%s4429_s3 + $0x110] sm:$0xff] }
 0x190   :  { %v1222_v50 = vld [vmem:[#allocation2 + $0x70] ss:$2 sm:$0xf]  ;;  %v1238_v5 = vld [vmem:[#allocation2 + $0x71] ss:$2 sm:$0xf]  ;;  %1712 = vmatpush.msra.mxu1 %v1671_v43 }
 0x191   :  { %v1254_v13 = vld [vmem:[#allocation2 + $0x72] ss:$2 sm:$0xf]  ;;  %1779 = vmatpush.msrb.mxu3 %v1694_v47  ;;  %v1193_v43 = vld [vmem:[#allocation2 + $0xa1] ss:$2 sm:$0xf] }
 0x193   :  { %v3723_v54 = vld.sshfl [vmem:[#allocation1 + $0x10] sm:$0xff pattern:$0x75316420] }
 0x194   :  { %v619_v48 = vpop.permute.xlu0 %618  ;;  %1432 = vst [vmem:[#allocation1 + $0x10] ss:$2 sm:$0xff] %v1220_v53 }
 0x195   :  { %v683_v52 = vpop.permute.xlu1 %682  ;;  %v914_v55 = vsel %vm900_vm5, %v897_v51, %v619_v48  ;;  %1434 = vst [vmem:[#allocation1 + $0x11] ss:$2 sm:$0xff] %v1222_v50  ;;  %v1670_v50 = vld [vmem:[%s4429_s3 + $0x50] sm:$0xff] }
 0x196   :  { %v931_v56 = vsel %vm917_vm6, %v914_v55, %v683_v52  ;;  %v813_v26 = vpop.permute.xlu2 %812  ;;  %v1686_v51 = vld [vmem:[%s4429_s3 + $0xd0] sm:$0xff]  ;;  %v1693_v52 = vld [vmem:[%s4429_s3 + $0x108] sm:$0xff]  ;;  %1713 = vmatpush.msra.mxu1 %v1670_v50 }
 0x197   :  { %v948_v60 = vsel %vm934_vm7, %v931_v56, %v747_v46  ;;  %v2566_v46 = vld [vmem:[%s4426_s0 + $0x300] ss:$2 sm:$0xff]  ;;  %1780 = vmatpush.msrb.mxu3 %v1693_v52 }
 0x198   :  { %v1669_v55 = vld [vmem:[%s4429_s3 + $0x48] sm:$0xff] }
 0x199   :  { %v1685_v56 = vld [vmem:[%s4429_s3 + $0xc8] sm:$0xff]  ;;  %1714 = vmatpush.msra.mxu1 %v1669_v55 }
 0x19a   :  { %v1209_v52 = vld [vmem:[#allocation2 + $0xa2] ss:$2 sm:$0xf] }
 0x19b   :  { %v1068_v58 = vpop.f32.mrf.mxu0 }
 0x19c   :  { %v1069_v49 = vadd.f32 %v3436_v31, %v1068_v58  ;;  %v811_v59 = vpop.permute.xlu0 %810  ;;  %v3731_v3 = vld.sshfl [vmem:[#allocation1 + $0x10] sm:$0xff pattern:$0x75316420] }
 0x19d   :  { %v365_v61 = vpop.permute.xlu1 %364  ;;  %v965_v63 = vsel %vm951_vm8, %v948_v60, %v811_v59  ;;  %1471 = vst [vmem:[#allocation1 + $0x10] ss:$2 sm:$0xff] %v1236_v1  ;;  %v1684_v59 = vld [vmem:[%s4429_s3 + $0xc0] sm:$0xff]  ;;  %v1284_v60 = vld [vmem:[#allocation2 + $0x61] ss:$2 sm:$0xf] }
 0x19e   :  { %v1102_v2 = vmax.f32 %v1069_v49, 0.0  ;;  %2709 = vmatmul.msk.f32.gmra.mxu0 %vm977_vm9, %v965_v63  ;;  %1473 = vst [vmem:[#allocation1 + $0x11] ss:$2 sm:$0xff] %v1238_v5  ;;  %v847_v62 = vsel %vm832_vm1, %v2565_v4, %v365_v61  ;;  %v495_v58 = vpop.permute.xlu2 %494  ;;  %v1668_v49 = vld [vmem:[%s4429_s3 + $0x40] sm:$0xff]  ;;  %v1667_v4 = vld [vmem:[%s4429_s3 + $0x38] sm:$0xff] }
 0x19f   :  { %v864_v8 = vsel %vm849_vm2, %v847_v62, %v429_v57  ;;  %v1692_v57 = vld [vmem:[%s4429_s3 + $0x100] sm:$0xff]  ;;  %1715 = vmatpush.msra.mxu1 %v1668_v49  ;;  %v1683_v62 = vld [vmem:[%s4429_s3 + $0xb8] sm:$0xff] }
 0x1a0   :  { %1160 = vst.msk [vmem:[#allocation2 + $0x81] sm:$0xff] %vm951_vm8, %v1102_v2  ;;  %1781 = vmatpush.msrb.mxu3 %v1692_v57 }
 0x1a1   :  { %1716 = vmatpush.msra.mxu1 %v1667_v4 }
 0x1a4   :  { %v493_v7 = vpop.permute.xlu0 %492 }
 0x1a5   :  { %v557_v9 = vpop.permute.xlu1 %556  ;;  %v881_v10 = vsel %vm866_vm3, %v864_v8, %v493_v7  ;;  %v3740_v12 = vld.sshfl [vmem:[#allocation1 + $0x10] sm:$0xff pattern:$0x75316420] }
 0x1a6   :  { %1502 = vst [vmem:[#allocation1 + $0x10] ss:$2 sm:$0xff] %v1252_v11  ;;  %v898_v14 = vsel %vm883_vm4, %v881_v10, %v557_v9  ;;  %v1682_v8 = vld [vmem:[%s4429_s3 + $0xb0] sm:$0xff]  ;;  %v1665_v10 = vld [vmem:[%s4429_s3 + $0x28] sm:$0xff] }
 0x1a7   :  { %1504 = vst [vmem:[#allocation1 + $0x11] ss:$2 sm:$0xff] %v1254_v13  ;;  %v915_v15 = vsel %vm900_vm5, %v898_v14, %v621_v6  ;;  %v1270_v37 = vld [vmem:[#allocation2 + $0x80] ss:$2 sm:$0xf]  ;;  %v1664_v14 = vld [vmem:[%s4429_s3 + $0x20] sm:$0xff] }
 0x1a8   :  { %v1286_v1 = vld [vmem:[#allocation2 + $0x81] ss:$2 sm:$0xf]  ;;  %v1302_v21 = vld [vmem:[#allocation2 + $0x82] ss:$2 sm:$0xf] }
 0x1a9   :  { %v1681_v11 = vld [vmem:[%s4429_s3 + $0xa8] sm:$0xff] }
 0x1ac   :  { %v685_v18 = vpop.permute.xlu0 %684 }
 0x1ad   :  { %v932_v22 = vsel %vm917_vm6, %v915_v15, %v685_v18  ;;  %v749_v23 = vpop.permute.xlu1 %748  ;;  %v1071_v25 = vpop.f32.mrf.mxu0 }
 0x1ae   :  { %v949_v27 = vsel %vm934_vm7, %v932_v22, %v749_v23  ;;  %v1072_v29 = vadd.f32 %v3436_v31, %v1071_v25  ;;  %v1514_v36 = vld.sshfl [vmem:[#allocation1 + $0x10] sm:$0xff pattern:$0x75316420]  ;;  %v687_v15 = vpop.permute.xlu2 %686 }
 0x1af   :  { %v966_v30 = vsel %vm951_vm8, %v949_v27, %v813_v26  ;;  %1541 = vst [vmem:[#allocation1 + $0x10] ss:$2 sm:$0xff] %v1268_v34  ;;  %v2750_v39 = vpack.i.bf16 %v3718_v42, %v1514_v36  ;;  %v1687_v42 = vld [vmem:[%s4429_s3 + $0xd8] sm:$0xff]  ;;  %v1677_v36 = vld [vmem:[%s4429_s3 + $0x88] sm:$0xff] }
 0x1b0   :  { %v1103_v35 = vmax.f32 %v1072_v29, 0.0  ;;  %2710 = vmatmul.msk.f32.gmra.mxu0 %vm977_vm9, %v966_v30  ;;  %1543 = vst [vmem:[#allocation1 + $0x11] ss:$2 sm:$0xff] %v1270_v37  ;;  %1741 = vmatpush.msra.mxu2 %v1687_v42  ;;  %v1660_v37 = vld [vmem:[%s4429_s3] sm:$0xff] }
 0x1b1   :  { %2751 = vrot.lane.b32.xlu2 %v2750_v39, %s2833_s15  ;;  %v1676_v39 = vld [vmem:[%s4429_s3 + $0x80] sm:$0xff] }
 0x1b2   :  { %1161 = vst.msk [vmem:[#allocation2 + $0xb1] sm:$0xff] %vm951_vm8, %v1103_v35  ;;  %1742 = vmatpush.msra.mxu2 %v1686_v51  ;;  %v1661_v35 = vld [vmem:[%s4429_s3 + $0x8] sm:$0xff] }
 0x1b4   :  { %v367_v45 = vpop.permute.xlu0 %366  ;;  %1743 = vmatpush.msra.mxu2 %v1685_v56 }
 0x1b5   :  { %v431_v48 = vpop.permute.xlu1 %430  ;;  %v848_v53 = vsel %vm832_vm1, %v2566_v46, %v367_v45 }
 0x1b6   :  { %v865_v63 = vsel %vm849_vm2, %v848_v53, %v431_v48  ;;  %1744 = vmatpush.msra.mxu2 %v1684_v59 }
 0x1b7   :  { %v1553_v61 = vld.sshfl [vmem:[#allocation1 + $0x10] sm:$0xff pattern:$0x75316420]  ;;  %v882_v6 = vsel %vm866_vm3, %v865_v63, %v495_v58 }
 0x1b8   :  { %1580 = vst [vmem:[#allocation1 + $0x10] ss:$2 sm:$0xff] %v1284_v60  ;;  %v2755_v2 = vpack.i.bf16 %v3723_v54, %v1553_v61  ;;  %v1666_v54 = vld [vmem:[%s4429_s3 + $0x30] sm:$0xff]  ;;  %1745 = vmatpush.msra.mxu2 %v1683_v62 }
 0x1b9   :  { %1582 = vst [vmem:[#allocation1 + $0x11] ss:$2 sm:$0xff] %v1286_v1  ;;  %1717 = vmatpush.msra.mxu1 %v1666_v54  ;;  %v2737_v50 = vpop.permute.xlu2 %2736 }
 0x1ba   :  { %2756 = vrot.lane.b32.xlu0 %v2755_v2, %s2835_s23  ;;  %1746 = vmatpush.msra.mxu2 %v1682_v8  ;;  %v2739_v53 = vunpack.i.h.bf16 %v2737_v50  ;;  %v2738_v55 = vunpack.i.l.bf16 %v2737_v50 }
 0x1bb   :  { %1718 = vmatpush.msra.mxu1 %v1665_v10 }
 0x1bc   :  { %v559_v5 = vpop.permute.xlu0 %558  ;;  %1747 = vmatpush.msra.mxu2 %v1681_v11  ;;  %v1634_v63 = vsel %vm951_vm8, %v3586_v38, %v2739_v53  ;;  %v1648_v1 = vsel %vm951_vm8, %v3667_v28, %v2738_v55  ;;  %v1240_v11 = vld [vmem:[#allocation2 + $0xb1] ss:$2 sm:$0xf] }
 0x1bd   :  { %v623_v7 = vpop.permute.xlu1 %622  ;;  %v899_v9 = vsel %vm883_vm4, %v882_v6, %v559_v5  ;;  %1719 = vmatpush.msra.mxu1 %v1664_v14  ;;  %v1256_v14 = vld [vmem:[#allocation2 + $0xb2] ss:$2 sm:$0xf] }
 0x1be   :  { %v916_v13 = vsel %vm900_vm5, %v899_v9, %v623_v7  ;;  %1748 = vmatpush.msra.mxu2 %v1680_v16  ;;  %v1224_v7 = vld [vmem:[#allocation2 + $0xb0] ss:$2 sm:$0xf] }
 0x1bf   :  { %v933_v25 = vsel %vm917_vm6, %v916_v13, %v687_v15  ;;  %1720 = vmatpush.msra.mxu1 %v1663_v19 }
 0x1c0   :  { %v1592_v18 = vld.sshfl [vmem:[#allocation1 + $0x10] sm:$0xff pattern:$0x75316420]  ;;  %1749 = vmatpush.msra.mxu2 %v1679_v20 }
 0x1c1   :  { %1619 = vst [vmem:[#allocation1 + $0x10] ss:$2 sm:$0xff] %v1300_v17  ;;  %v2760_v22 = vpack.i.bf16 %v3731_v3, %v1592_v18  ;;  %v1678_v3 = vld [vmem:[%s4429_s3 + $0x90] sm:$0xff]  ;;  %1721 = vmatpush.msra.mxu1 %v1662_v32 }
 0x1c2   :  { %1621 = vst [vmem:[#allocation1 + $0x11] ss:$2 sm:$0xff] %v1302_v21  ;;  %1750 = vmatpush.msra.mxu2 %v1678_v3 }
 0x1c3   :  { %2761 = vrot.lane.b32.xlu1 %v2760_v22, %s2836_s27  ;;  %1722 = vmatpush.msra.mxu1 %v1661_v35 }
 0x1c4   :  { %v751_v23 = vpop.permute.xlu0 %750  ;;  %v1074_v26 = vpop.f32.mrf.mxu0  ;;  %1751 = vmatpush.msra.mxu2 %v1677_v36 }
 0x1c5   :  { %v950_v27 = vsel %vm934_vm7, %v933_v25, %v751_v23  ;;  %v1075_v29 = vadd.f32 %v3436_v31, %v1074_v26  ;;  %v815_v30 = vpop.permute.xlu1 %814  ;;  %1723 = vmatpush.msra.mxu1 %v1660_v37 }
 0x1c6   :  { %v967_v33 = vsel %vm951_vm8, %v950_v27, %v815_v30  ;;  %1752 = vmatpush.msra.mxu2 %v1676_v39 }
 0x1c7   :  { %v1104_v34 = vmax.f32 %v1075_v29, 0.0  ;;  %2711 = vmatmul.msk.f32.vlgmr.msra.gmra.mxu3 %vm977_vm9, %v967_v33 }
 0x1c9   :  { %1162 = vst.msk [vmem:[#allocation2 + $0xc1] sm:$0xff] %vm951_vm8, %v1104_v34  ;;  %v1631_v44 = vld.sshfl [vmem:[#allocation1 + $0x10] sm:$0xff pattern:$0x75316420] }
 0x1cf   :  { %2712 = vmatmul.msk.f32.vlgmr.msrb.gmra.mxu3 %vm951_vm8, %v1630_v40 }
 0x1d0   :  { %v1179_v41 = vld [vmem:[#allocation2 + $0xc0] ss:$2 sm:$0xf]  ;;  %v1195_v45 = vld [vmem:[#allocation2 + $0xc1] ss:$2 sm:$0xf] }
 0x1d1   :  { %1329 = vst [vmem:[#allocation1 + $0x21] ss:$2 sm:$0xff] %v1179_v41  ;;  %v1211_v49 = vld [vmem:[#allocation2 + $0xc2] ss:$2 sm:$0xf] }
 0x1d2   :  { %v1272_v19 = vld [vmem:[#allocation2 + $0xc0] ss:$2 sm:$0xf]  ;;  %v1288_v26 = vld [vmem:[#allocation2 + $0xc1] ss:$2 sm:$0xf] }
 0x1d3   :  { %v1304_v30 = vld [vmem:[#allocation2 + $0xc2] ss:$2 sm:$0xf] }
 0x1d7   :  { %2713 = vmatmul.msk.f32.gmra.mxu3 %vm951_vm8, %v1631_v44 }
 0x1d8   :  { %v3880_v42 = vld.sshfl [vmem:[#allocation1 + $0x20] sm:$0xff pattern:$0x75316420] }
 0x1d9   :  { %1358 = vst [vmem:[#allocation1 + $0x20] ss:$2 sm:$0xff] %v1193_v43 }
 0x1da   :  { %1360 = vst [vmem:[#allocation1 + $0x21] ss:$2 sm:$0xff] %v1195_v45  ;;  %v2742_v51 = vpop.permute.xlu0 %2741 }
 0x1db   :  { %v1077_v46 = vpop.f32.mrf.mxu0  ;;  %v2744_v57 = vunpack.i.h.bf16 %v2742_v51  ;;  %v2743_v58 = vunpack.i.l.bf16 %v2742_v51 }
 0x1dc   :  { %v1078_v47 = vadd.f32 %v3436_v31, %v1077_v46 }
 0x1dd   :  { %v1639_v2 = vsel %vm1638_vm11, %v1634_v63, %v2744_v57  ;;  %v1652_v4 = vsel %vm1638_vm11, %v1648_v1, %v2743_v58 }
 0x1de   :  { %v1105_v48 = vmax.f32 %v1078_v47, 0.0 }
 0x1e0   :  { %1163 = vst.msk [vmem:[#allocation2 + $0xd1] sm:$0xff] %vm951_vm8, %v1105_v48 }
 0x1e1   :  { %v1367_v56 = vld.sshfl [vmem:[#allocation1 + $0x20] sm:$0xff pattern:$0x75316420] }
 0x1e2   :  { %1397 = vst [vmem:[#allocation1 + $0x20] ss:$2 sm:$0xff] %v1209_v52 }
 0x1e3   :  { %1399 = vst [vmem:[#allocation1 + $0x21] ss:$2 sm:$0xff] %v1211_v49  ;;  %v2747_v59 = vpop.permute.xlu1 %2746 }
 0x1e4   :  { %v2749_v60 = vunpack.i.h.bf16 %v2747_v59  ;;  %v2748_v61 = vunpack.i.l.bf16 %v2747_v59 }
 0x1e6   :  { %v1644_v5 = vsel %vm1643_vm12, %v1639_v2, %v2749_v60  ;;  %v1656_v62 = vsel %vm1643_vm12, %v1652_v4, %v2748_v61 }
 0x1e7   :  { %1724 = vmatmul.f32.vlgmr.msra.gmra.mxu1 %v1644_v5  ;;  %1753 = vmatmul.f32.vlgmr.msra.gmra.mxu2 %v1656_v62  ;;  %v1226_v6 = vld [vmem:[#allocation2 + $0xd0] ss:$2 sm:$0xf]  ;;  %v1242_v28 = vld [vmem:[#allocation2 + $0xd1] ss:$2 sm:$0xf] }
 0x1e8   :  { %v1258_v17 = vld [vmem:[#allocation2 + $0xd2] ss:$2 sm:$0xf] }
 0x1ea   :  { %v1406_v54 = vld.sshfl [vmem:[#allocation1 + $0x20] sm:$0xff pattern:$0x75316420] }
 0x1eb   :  { %1436 = vst [vmem:[#allocation1 + $0x20] ss:$2 sm:$0xff] %v1224_v7 }
 0x1ec   :  { %1438 = vst [vmem:[#allocation1 + $0x21] ss:$2 sm:$0xff] %v1226_v6 }
 0x1ed   :  { %v1080_v8 = vpop.f32.mrf.mxu0 }
 0x1ee   :  { %v1081_v38 = vadd.f32 %v3436_v31, %v1080_v8  ;;  %v3899_v31 = vld [vmem:[%s4428_s2] ss:$0 sm:$0xff] }
 0x1f0   :  { %v1106_v9 = vmax.f32 %v1081_v38, 0.0 }
 0x1f2   :  { %1164 = vst.msk [vmem:[#allocation2 + $0xe1] sm:$0xff] %vm951_vm8, %v1106_v9 }
 0x1f3   :  { %v1445_v10 = vld.sshfl [vmem:[#allocation1 + $0x20] sm:$0xff pattern:$0x75316420] }
 0x1f4   :  { %1477 = vst [vmem:[#allocation1 + $0x21] ss:$2 sm:$0xff] %v1242_v28 }
 0x1f5   :  { %1475 = vst [vmem:[#allocation1 + $0x20] ss:$2 sm:$0xff] %v1240_v11 }
 0x1f9   :  { %v1181_v13 = vld [vmem:[#allocation2 + $0xe0] ss:$2 sm:$0xf]  ;;  %v1290_v29 = vld [vmem:[#allocation2 + $0xe1] ss:$2 sm:$0xf] }
 0x1fa   :  { %1331 = vst [vmem:[#allocation1 + $0x30] ss:$2 sm:$0xff] %v1181_v13  ;;  %v1274_v22 = vld [vmem:[#allocation2 + $0xe0] ss:$2 sm:$0xf] }
 0x1fb   :  { %v1306_v3 = vld [vmem:[#allocation2 + $0xe2] ss:$2 sm:$0xf]  ;;  %v1197_v44 = vld [vmem:[#allocation2 + $0xe1] ss:$2 sm:$0xf] }
 0x1fc   :  { %v3894_v16 = vld.sshfl [vmem:[#allocation1 + $0x20] sm:$0xff pattern:$0x75316420]  ;;  %v1213_v49 = vld [vmem:[#allocation2 + $0xe2] ss:$2 sm:$0xf] }
 0x1fd   :  { %1506 = vst [vmem:[#allocation1 + $0x20] ss:$2 sm:$0xff] %v1256_v14 }
 0x1fe   :  { %1508 = vst [vmem:[#allocation1 + $0x21] ss:$2 sm:$0xff] %v1258_v17 }
 0x204   :  { %v1083_v18 = vpop.f32.mrf.mxu0 }
 0x205   :  { %v1084_v15 = vadd.f32 %v3899_v31, %v1083_v18  ;;  %v1515_v20 = vld.sshfl [vmem:[#allocation1 + $0x20] sm:$0xff pattern:$0x75316420]  ;;  %v1838_v18 = vld [vmem:[#allocation3 + $0x30] ss:$2 sm:$0x3] }
 0x206   :  { %v2765_v23 = vpack.i.bf16 %v1367_v56, %v1515_v20  ;;  %1545 = vst [vmem:[#allocation1 + $0x20] ss:$2 sm:$0xff] %v1272_v19 }
 0x207   :  { %v1107_v21 = vmax.f32 %v1084_v15, 0.0  ;;  %1547 = vst [vmem:[#allocation1 + $0x21] ss:$2 sm:$0xff] %v1274_v22 }
 0x208   :  { %2766 = vrot.lane.b32.xlu2 %v2765_v23, %s2833_s15  ;;  %1912 = vst [vmem:[#allocation1 + $0x2] ss:$4 sm:$0xff] %v1838_v18  ;;  %v1842_v18 = vld [vmem:[#allocation3 + $0x1] ss:$2 sm:$0x3] }
 0x209   :  { %1165 = vst.msk [vmem:[#allocation2 + $0xf1] sm:$0xff] %vm951_vm8, %v1107_v21 }
 0x20b   :  { %v2752_v45 = vpop.permute.xlu2 %2751 }
 0x20c   :  { %v2754_v48 = vunpack.i.h.bf16 %v2752_v45  ;;  %v2753_v50 = vunpack.i.l.bf16 %v2752_v45 }
 0x20e   :  { %v1554_v25 = vld.sshfl [vmem:[#allocation1 + $0x20] sm:$0xff pattern:$0x75316420]  ;;  %v1635_v57 = vsel %vm951_vm8, %v3706_v24, %v2754_v48  ;;  %v1649_v58 = vsel %vm951_vm8, %v3740_v12, %v2753_v50 }
 0x20f   :  { %v2770_v27 = vpack.i.bf16 %v1406_v54, %v1554_v25  ;;  %1584 = vst [vmem:[#allocation1 + $0x20] ss:$2 sm:$0xff] %v1288_v26 }
 0x210   :  { %1451 = vrot.lane.b32.xlu2 %v1445_v10, %s2836_s27  ;;  %1586 = vst [vmem:[#allocation1 + $0x21] ss:$2 sm:$0xff] %v1290_v29  ;;  %v1228_v4 = vld [vmem:[#allocation2 + $0xf0] ss:$2 sm:$0xf] }
 0x211   :  { %2771 = vrot.lane.b32.xlu0 %v2770_v27, %s2835_s23  ;;  %v1244_v54 = vld [vmem:[#allocation2 + $0xf1] ss:$2 sm:$0xf]  ;;  %v1260_v9 = vld [vmem:[#allocation2 + $0xf2] ss:$2 sm:$0xf] }
 0x212   :  { %v1834_v10 = vld [vmem:[#allocation3] ss:$2 sm:$0x3] }
 0x213   :  { %1908 = vst [vmem:[#allocation1] ss:$4 sm:$0xff] %v1834_v10 }
 0x217   :  { %v1593_v32 = vld.sshfl [vmem:[#allocation1 + $0x20] sm:$0xff pattern:$0x75316420] }
 0x218   :  { %1623 = vst [vmem:[#allocation1 + $0x20] ss:$2 sm:$0xff] %v1304_v30  ;;  %1599 = vrot.lane.b32.xlu1 %v1593_v32, %s2836_s27 }
 0x219   :  { %1625 = vst [vmem:[#allocation1 + $0x21] ss:$2 sm:$0xff] %v1306_v3 }
 0x21b   :  { %v1086_v33 = vpop.f32.mrf.mxu0 }
 0x21c   :  { %v1087_v34 = vadd.f32 %v3899_v31, %v1086_v33 }
 0x21e   :  { %v1108_v35 = vmax.f32 %v1087_v34, 0.0 }
 0x220   :  { %1166 = vst.msk [vmem:[#allocation2 + $0x101] sm:$0xff] %vm951_vm8, %v1108_v35  ;;  %v1632_v36 = vld.sshfl [vmem:[#allocation1 + $0x20] sm:$0xff pattern:$0x75316420] }
 0x221   :  { %2714 = vmatmul.msk.f32.gmra.mxu3 %vm951_vm8, %v1632_v36 }
 0x227   :  { %v1183_v37 = vld [vmem:[#allocation2 + $0x100] ss:$2 sm:$0xf]  ;;  %v1199_v46 = vld [vmem:[#allocation2 + $0x101] ss:$2 sm:$0xf] }
 0x228   :  { %1333 = vst [vmem:[#allocation1 + $0x31] ss:$2 sm:$0xff] %v1183_v37  ;;  %v1215_v63 = vld [vmem:[#allocation2 + $0x102] ss:$2 sm:$0xf] }
 0x229   :  { %v1276_v11 = vld [vmem:[#allocation2 + $0x100] ss:$2 sm:$0xf]  ;;  %v1292_v15 = vld [vmem:[#allocation2 + $0x101] ss:$2 sm:$0xf] }
 0x22a   :  { %v1308_v29 = vld [vmem:[#allocation2 + $0x102] ss:$2 sm:$0xf] }
 0x22c   :  { %v2757_v47 = vpop.permute.xlu0 %2756 }
 0x22d   :  { %v1089_v39 = vpop.f32.mrf.mxu0  ;;  %v2759_v51 = vunpack.i.h.bf16 %v2757_v47  ;;  %v2758_v52 = vunpack.i.l.bf16 %v2757_v47 }
 0x22e   :  { %v1090_v40 = vadd.f32 %v3899_v31, %v1089_v39 }
 0x22f   :  { %v3911_v43 = vld.sshfl [vmem:[#allocation1 + $0x30] sm:$0xff pattern:$0x75316420]  ;;  %v1640_v60 = vsel %vm1638_vm11, %v1635_v57, %v2759_v51  ;;  %v1653_v61 = vsel %vm1638_vm11, %v1649_v58, %v2758_v52 }
 0x230   :  { %v1109_v41 = vmax.f32 %v1090_v40, 0.0  ;;  %1362 = vst [vmem:[#allocation1 + $0x30] ss:$2 sm:$0xff] %v1197_v44 }
 0x231   :  { %1364 = vst [vmem:[#allocation1 + $0x31] ss:$2 sm:$0xff] %v1199_v46 }
 0x232   :  { %1167 = vst.msk [vmem:[#allocation2 + $0x111] sm:$0xff] %vm951_vm8, %v1109_v41 }
 0x235   :  { %v2762_v53 = vpop.permute.xlu1 %2761 }
 0x236   :  { %v2764_v55 = vunpack.i.h.bf16 %v2762_v53  ;;  %v2763_v56 = vunpack.i.l.bf16 %v2762_v53 }
 0x238   :  { %v1368_v59 = vld.sshfl [vmem:[#allocation1 + $0x30] sm:$0xff pattern:$0x75316420]  ;;  %v1645_v1 = vsel %vm1643_vm12, %v1640_v60, %v2764_v55  ;;  %v1657_v2 = vsel %vm1643_vm12, %v1653_v61, %v2763_v56 }
 0x239   :  { %1401 = vst [vmem:[#allocation1 + $0x30] ss:$2 sm:$0xff] %v1213_v49  ;;  %1727 = vmatmul.f32.gmra.mxu1 %v1645_v1  ;;  %1756 = vmatmul.f32.gmra.mxu2 %v1657_v2  ;;  %v1230_v5 = vld [vmem:[#allocation2 + $0x110] ss:$2 sm:$0xf] }
 0x23a   :  { %1403 = vst [vmem:[#allocation1 + $0x31] ss:$2 sm:$0xff] %v1215_v63  ;;  %v1246_v6 = vld [vmem:[#allocation2 + $0x111] ss:$2 sm:$0xf] }
 0x23b   :  { %v1262_v28 = vld [vmem:[#allocation2 + $0x112] ss:$2 sm:$0xf] }
 0x241   :  { %v1407_v24 = vld.sshfl [vmem:[#allocation1 + $0x30] sm:$0xff pattern:$0x75316420] }
 0x242   :  { %1440 = vst [vmem:[#allocation1 + $0x30] ss:$2 sm:$0xff] %v1228_v4 }
 0x243   :  { %1442 = vst [vmem:[#allocation1 + $0x31] ss:$2 sm:$0xff] %v1230_v5 }
 0x24a   :  { %v1092_v12 = vpop.f32.mrf.mxu3  ;;  %v1446_v7 = vld.sshfl [vmem:[#allocation1 + $0x30] sm:$0xff pattern:$0x75316420] }
 0x24b   :  { %v1093_v62 = vadd.f32 %v3899_v31, %v1092_v12  ;;  %1481 = vst [vmem:[#allocation1 + $0x31] ss:$2 sm:$0xff] %v1246_v6  ;;  %v3950_v31 = vld [vmem:[%s4430_s4] ss:$0 sm:$0xff] }
 0x24c   :  { %1479 = vst [vmem:[#allocation1 + $0x30] ss:$2 sm:$0xff] %v1244_v54 }
 0x24d   :  { %v1110_v8 = vmax.f32 %v1093_v62, 0.0 }
 0x24f   :  { %1168 = vst.msk [vmem:[#allocation2 + $0x121] sm:$0xff] %vm951_vm8, %v1110_v8 }
 0x252   :  { %v1783_v26 = vpop.f32.mrf.mxu3 }
 0x253   :  { %v3930_v38 = vld.sshfl [vmem:[#allocation1 + $0x30] sm:$0xff pattern:$0x75316420] }
 0x254   :  { %1510 = vst [vmem:[#allocation1 + $0x30] ss:$2 sm:$0xff] %v1260_v9 }
 0x255   :  { %1512 = vst [vmem:[#allocation1 + $0x31] ss:$2 sm:$0xff] %v1262_v28 }
 0x256   :  { %v1278_v13 = vld [vmem:[#allocation2 + $0x120] ss:$2 sm:$0xf]  ;;  %v1294_v21 = vld [vmem:[#allocation2 + $0x121] ss:$2 sm:$0xf] }
 0x257   :  { %v1310_v3 = vld [vmem:[#allocation2 + $0x122] ss:$2 sm:$0xf] }
 0x25a   :  { %v1786_v58 = vpop.f32.mrf.mxu3 }
 0x25c   :  { %v1516_v14 = vld.sshfl [vmem:[#allocation1 + $0x30] sm:$0xff pattern:$0x75316420] }
 0x25d   :  { %v2775_v17 = vpack.i.bf16 %v1368_v59, %v1516_v14  ;;  %1549 = vst [vmem:[#allocation1 + $0x30] ss:$2 sm:$0xff] %v1276_v11 }
 0x25e   :  { %1551 = vst [vmem:[#allocation1 + $0x31] ss:$2 sm:$0xff] %v1278_v13 }
 0x25f   :  { %2776 = vrot.lane.b32.xlu0 %v2775_v17, %s2833_s15 }
 0x262   :  { %v2767_v36 = vpop.permute.xlu2 %2766 }
 0x263   :  { %v2769_v37 = vunpack.i.h.bf16 %v2767_v36  ;;  %v2768_v44 = vunpack.i.l.bf16 %v2767_v36 }
 0x264   :  { %v1725_v19 = vpop.f32.mrf.mxu1 }
 0x265   :  { %v1555_v20 = vld.sshfl [vmem:[#allocation1 + $0x30] sm:$0xff pattern:$0x75316420]  ;;  %v1726_v23 = vadd.f32 %v3950_v31, %v1725_v19  ;;  %v1636_v41 = vsel %vm951_vm8, %v3880_v42, %v2769_v37  ;;  %v1650_v50 = vsel %vm951_vm8, %v3894_v16, %v2768_v44 }
 0x266   :  { %v2780_v22 = vpack.i.bf16 %v1407_v24, %v1555_v20  ;;  %1588 = vst [vmem:[#allocation1 + $0x30] ss:$2 sm:$0xff] %v1292_v15  ;;  %v1846_v15 = vld [vmem:[#allocation3 + $0x31] ss:$2 sm:$0x3] }
 0x267   :  { %1453 = vrot.lane.b32.xlu0 %v1446_v7, %s2836_s27  ;;  %1590 = vst [vmem:[#allocation1 + $0x31] ss:$2 sm:$0xff] %v1294_v21 }
 0x268   :  { %2781 = vrot.lane.b32.xlu1 %v2780_v22, %s2835_s23  ;;  %v1850_v22 = vld [vmem:[#allocation3 + $0x2] ss:$2 sm:$0x3] }
 0x26a   :  { %v1754_v25 = vpop.f32.mrf.mxu2  ;;  %v1452_v45 = vpop.permute.xlu2 %1451 }
 0x26b   :  { %v1755_v0 = vadd.f32 %v1754_v25, %v1726_v23  ;;  %v1854_v23 = vld [vmem:[#allocation3 + $0x32] ss:$2 sm:$0x3] }
 0x26d   :  { %v1784_v27 = vadd.f32 %v1783_v26, %v1755_v0 }
 0x26e   :  { %v1594_v32 = vld.sshfl [vmem:[#allocation1 + $0x30] sm:$0xff pattern:$0x75316420] }
 0x26f   :  { %v1795_v30 = vmax.f32 %v1784_v27, 0.0  ;;  %1627 = vst [vmem:[#allocation1 + $0x30] ss:$2 sm:$0xff] %v1308_v29  ;;  %1601 = vrot.lane.b32.xlu2 %v1594_v32, %s2836_s27 }
 0x270   :  { %1629 = vst [vmem:[#allocation1 + $0x31] ss:$2 sm:$0xff] %v1310_v3 }
 0x271   :  { %v1816_v33 = vrot.slane %v1795_v30, 4  ;;  %1826 = vst.msk [vmem:[#allocation3 + $0x9] sm:$0xf] %vm1825_vm14, %v1795_v30 }
 0x273   :  { %1827 = vst.msk [vmem:[#allocation3 + $0x11] sm:$0xf] %vm1825_vm14, %v1816_v33 }
 0x277   :  { %v1633_v34 = vld.sshfl [vmem:[#allocation1 + $0x30] sm:$0xff pattern:$0x75316420] }
 0x278   :  { %2715 = vmatmul.msk.f32.gmra.mxu3 %vm951_vm8, %v1633_v34  ;;  %v1857_v30 = vld [vmem:[#allocation3 + $0x8] ss:$2 sm:$0x3]  ;;  %v1865_v44 = vld [vmem:[#allocation3 + $0x9] ss:$2 sm:$0x3] }
 0x27a   :  { %v1836_v35 = vld [vmem:[#allocation3 + $0x10] ss:$2 sm:$0x3]  ;;  %v1844_v20 = vld [vmem:[#allocation3 + $0x11] ss:$2 sm:$0x3] }
 0x27b   :  { %1910 = vst [vmem:[#allocation1 + $0x1] ss:$4 sm:$0xff] %v1836_v35  ;;  %v1852_v0 = vld [vmem:[#allocation3 + $0x12] ss:$2 sm:$0x3] }
 0x283   :  { %v2772_v39 = vpop.permute.xlu0 %2771 }
 0x284   :  { %v2774_v40 = vunpack.i.h.bf16 %v2772_v39  ;;  %v2773_v47 = vunpack.i.l.bf16 %v2772_v39 }
 0x286   :  { %v1641_v46 = vsel %vm1638_vm11, %v1636_v41, %v2774_v40  ;;  %v1654_v52 = vsel %vm1638_vm11, %v1650_v50, %v2773_v47 }
 0x287   :  { %v1646_v48 = vsel %vm1643_vm12, %v1641_v46, %v1452_v45 }
 0x288   :  { %1730 = vmatmul.f32.gmra.mxu1 %v1646_v48  ;;  %v1873_v48 = vld [vmem:[#allocation3 + $0xa] ss:$2 sm:$0x3] }
 0x28a   :  { %v1600_v51 = vpop.permute.xlu1 %1599 }
 0x28b   :  { %v1658_v53 = vsel %vm1643_vm12, %v1654_v52, %v1600_v51 }
 0x28c   :  { %1759 = vmatmul.f32.gmra.mxu2 %v1658_v53 }
 0x2a4   :  { %v1789_v11 = vpop.f32.mrf.mxu3 }
 0x2b6   :  { %v1728_v55 = vpop.f32.mrf.mxu1 }
 0x2b7   :  { %v1729_v42 = vadd.f32 %v3950_v31, %v1728_v55  ;;  %v2047_v55 = vld [vmem:[%s4431_s5 + $0x78] sm:$0xff] }
 0x2b8   :  { %2110 = vmatpush.msra.mxu3 %v2047_v55 }
 0x2bc   :  { %v1757_v56 = vpop.f32.mrf.mxu2 }
 0x2bd   :  { %v1758_v57 = vadd.f32 %v1757_v56, %v1729_v42  ;;  %v2046_v42 = vld [vmem:[%s4431_s5 + $0x70] sm:$0xff]  ;;  %v2063_v56 = vld [vmem:[%s4431_s5 + $0xf8] sm:$0xff] }
 0x2be   :  { %2130 = vmatpush.msrb.mxu1 %v2063_v56  ;;  %2111 = vmatpush.msra.mxu3 %v2046_v42  ;;  %v2102_v42 = vld [vmem:[%s4431_s5 + $0x230] sm:$0xff]  ;;  %v2093_v56 = vld [vmem:[%s4431_s5 + $0x1e8] sm:$0xff] }
 0x2bf   :  { %v1787_v49 = vadd.f32 %v1786_v58, %v1758_v57  ;;  %v2045_v57 = vld [vmem:[%s4431_s5 + $0x68] sm:$0xff]  ;;  %v2062_v58 = vld [vmem:[%s4431_s5 + $0xf0] sm:$0xff] }
 0x2c0   :  { %2131 = vmatpush.msrb.mxu1 %v2062_v58  ;;  %2112 = vmatpush.msra.mxu3 %v2045_v57  ;;  %v2092_v57 = vld [vmem:[%s4431_s5 + $0x1e0] sm:$0xff]  ;;  %v2091_v58 = vld [vmem:[%s4431_s5 + $0x1d8] sm:$0xff] }
 0x2c1   :  { %v1796_v59 = vmax.f32 %v1787_v49, 0.0  ;;  %v2061_v49 = vld [vmem:[%s4431_s5 + $0xe8] sm:$0xff] }
 0x2c2   :  { %2132 = vmatpush.msrb.mxu1 %v2061_v49  ;;  %v2090_v49 = vld [vmem:[%s4431_s5 + $0x1d0] sm:$0xff] }
 0x2c3   :  { %v1817_v60 = vrot.slane %v1796_v59, 4  ;;  %1828 = vst.msk [vmem:[#allocation3 + $0x19] sm:$0xf] %vm1825_vm14, %v1796_v59  ;;  %v1881_v59 = vld [vmem:[#allocation3 + $0x10] ss:$2 sm:$0x3] }
 0x2c5   :  { %1829 = vst.msk [vmem:[#allocation3 + $0x21] sm:$0xf] %vm1825_vm14, %v1817_v60  ;;  %v2044_v60 = vld [vmem:[%s4431_s5 + $0x60] sm:$0xff] }
 0x2c6   :  { %2113 = vmatpush.msra.mxu3 %v2044_v60  ;;  %v2089_v60 = vld [vmem:[%s4431_s5 + $0x1c8] sm:$0xff] }
 0x2c9   :  { %v1602_v12 = vpop.permute.xlu2 %1601 }
 0x2ca   :  { %v1859_v32 = vld [vmem:[#allocation3 + $0x18] ss:$2 sm:$0x3]  ;;  %v1867_v46 = vld [vmem:[#allocation3 + $0x19] ss:$2 sm:$0x3] }
 0x2cb   :  { %v1875_v51 = vld [vmem:[#allocation3 + $0x1a] ss:$2 sm:$0x3] }
 0x2d1   :  { %v2777_v16 = vpop.permute.xlu0 %2776 }
 0x2d2   :  { %v2779_v61 = vunpack.i.h.bf16 %v2777_v16  ;;  %v2778_v63 = vunpack.i.l.bf16 %v2777_v16  ;;  %v1883_v16 = vld [vmem:[#allocation3 + $0x20] ss:$2 sm:$0x3] }
 0x2d4   :  { %v1637_v24 = vsel %vm951_vm8, %v3911_v43, %v2779_v61  ;;  %v1651_v5 = vsel %vm951_vm8, %v3930_v38, %v2778_v63  ;;  %v2060_v61 = vld [vmem:[%s4431_s5 + $0xe0] sm:$0xff] }
 0x2d5   :  { %2133 = vmatpush.msrb.mxu1 %v2060_v61  ;;  %v2068_v61 = vld [vmem:[%s4431_s5 + $0x120] sm:$0xff] }
 0x2d9   :  { %v1454_v62 = vpop.permute.xlu0 %1453 }
 0x2da   :  { %v2782_v1 = vpop.permute.xlu1 %2781 }
 0x2db   :  { %v2784_v2 = vunpack.i.h.bf16 %v2782_v1  ;;  %v2783_v4 = vunpack.i.l.bf16 %v2782_v1 }
 0x2dd   :  { %v1642_v6 = vsel %vm1638_vm11, %v1637_v24, %v2784_v2  ;;  %v1655_v7 = vsel %vm1638_vm11, %v1651_v5, %v2783_v4  ;;  %v2043_v2 = vld [vmem:[%s4431_s5 + $0x58] sm:$0xff] }
 0x2de   :  { %v1647_v54 = vsel %vm1643_vm12, %v1642_v6, %v1454_v62  ;;  %v1659_v8 = vsel %vm1643_vm12, %v1655_v7, %v1602_v12  ;;  %v2059_v5 = vld [vmem:[%s4431_s5 + $0xd8] sm:$0xff]  ;;  %v2042_v62 = vld [vmem:[%s4431_s5 + $0x50] sm:$0xff]  ;;  %2114 = vmatpush.msra.mxu3 %v2043_v2 }
 0x2df   :  { %1733 = vmatmul.f32.gmra.mxu1 %v1647_v54  ;;  %1762 = vmatmul.f32.gmra.mxu2 %v1659_v8  ;;  %v2079_v12 = vld [vmem:[%s4431_s5 + $0x178] sm:$0xff]  ;;  %v2078_v6 = vld [vmem:[%s4431_s5 + $0x170] sm:$0xff]  ;;  %v2077_v54 = vld [vmem:[%s4431_s5 + $0x168] sm:$0xff] }
 0x2e0   :  { %2150 = vmatpush.msrb.mxu2 %v2079_v12  ;;  %v2058_v7 = vld [vmem:[%s4431_s5 + $0xd0] sm:$0xff]  ;;  %v2041_v8 = vld [vmem:[%s4431_s5 + $0x48] sm:$0xff]  ;;  %2134 = vmatpush.msrb.mxu1 %v2059_v5  ;;  %v2067_v2 = vld [vmem:[%s4431_s5 + $0x118] sm:$0xff] }
 0x2e1   :  { %2115 = vmatpush.msra.mxu3 %v2042_v62  ;;  %v2066_v5 = vld [vmem:[%s4431_s5 + $0x110] sm:$0xff] }
 0x2e2   :  { %2151 = vmatpush.msrb.mxu2 %v2078_v6  ;;  %2135 = vmatpush.msrb.mxu1 %v2058_v7  ;;  %v2086_v12 = vld [vmem:[%s4431_s5 + $0x1b0] sm:$0xff]  ;;  %v2065_v6 = vld [vmem:[%s4431_s5 + $0x108] sm:$0xff] }
 0x2e3   :  { %2116 = vmatpush.msra.mxu3 %v2041_v8  ;;  %v2098_v62 = vld [vmem:[%s4431_s5 + $0x210] sm:$0xff]  ;;  %v2085_v7 = vld [vmem:[%s4431_s5 + $0x1a8] sm:$0xff]  ;;  %v2064_v8 = vld [vmem:[%s4431_s5 + $0x100] sm:$0xff] }
 0x2e4   :  { %2152 = vmatpush.msrb.mxu2 %v2077_v54  ;;  %v2097_v54 = vld [vmem:[%s4431_s5 + $0x208] sm:$0xff] }
 0x2fb   :  { %v1792_v36 = vpop.f32.mrf.mxu3 }
 0x305   :  { %v1731_v9 = vpop.f32.mrf.mxu1 }
 0x306   :  { %v1732_v28 = vadd.f32 %v3950_v31, %v1731_v9  ;;  %v2057_v9 = vld [vmem:[%s4431_s5 + $0xc8] sm:$0xff] }
 0x307   :  { %2136 = vmatpush.msrb.mxu1 %v2057_v9  ;;  %v2084_v9 = vld [vmem:[%s4431_s5 + $0x1a0] sm:$0xff] }
 0x30f   :  { %v1760_v10 = vpop.f32.mrf.mxu2 }
 0x310   :  { %v1761_v43 = vadd.f32 %v1760_v10, %v1732_v28  ;;  %v2076_v28 = vld [vmem:[%s4431_s5 + $0x160] sm:$0xff] }
 0x311   :  { %v2040_v10 = vld [vmem:[%s4431_s5 + $0x40] sm:$0xff]  ;;  %2153 = vmatpush.msrb.mxu2 %v2076_v28 }
 0x312   :  { %v1790_v13 = vadd.f32 %v1789_v11, %v1761_v43  ;;  %v2056_v43 = vld [vmem:[%s4431_s5 + $0xc0] sm:$0xff]  ;;  %v2075_v11 = vld [vmem:[%s4431_s5 + $0x158] sm:$0xff]  ;;  %2117 = vmatpush.msra.mxu3 %v2040_v10 }
 0x313   :  { %2137 = vmatpush.msrb.mxu1 %v2056_v43  ;;  %2154 = vmatpush.msrb.mxu2 %v2075_v11  ;;  %v2096_v28 = vld [vmem:[%s4431_s5 + $0x200] sm:$0xff]  ;;  %v2083_v10 = vld [vmem:[%s4431_s5 + $0x198] sm:$0xff]  ;;  %v2082_v43 = vld [vmem:[%s4431_s5 + $0x190] sm:$0xff] }
 0x314   :  { %v1797_v38 = vmax.f32 %v1790_v13, 0.0  ;;  %v2039_v13 = vld [vmem:[%s4431_s5 + $0x38] sm:$0xff] }
 0x315   :  { %2118 = vmatpush.msra.mxu3 %v2039_v13  ;;  %v2230_v11 = vld [vmem:[%s4433_s7 + $0x78] sm:$0xff]  ;;  %v2229_v13 = vld [vmem:[%s4433_s7 + $0x70] sm:$0xff] }
 0x316   :  { %v1818_v14 = vrot.slane %v1797_v38, 4  ;;  %1830 = vst.msk [vmem:[#allocation3 + $0x39] sm:$0xf] %vm1825_vm14, %v1797_v38  ;;  %v1889_v38 = vld [vmem:[#allocation3 + $0x11] ss:$2 sm:$0x3] }
 0x318   :  { %1831 = vst.msk [vmem:[#allocation3 + $0x41] sm:$0xf] %vm1825_vm14, %v1818_v14  ;;  %v2055_v14 = vld [vmem:[%s4431_s5 + $0xb8] sm:$0xff] }
 0x319   :  { %2138 = vmatpush.msrb.mxu1 %v2055_v14  ;;  %v2228_v14 = vld [vmem:[%s4433_s7 + $0x68] sm:$0xff] }
 0x31d   :  { %v1861_v27 = vld [vmem:[#allocation3 + $0x38] ss:$2 sm:$0x3]  ;;  %v1869_v47 = vld [vmem:[#allocation3 + $0x39] ss:$2 sm:$0x3] }
 0x31e   :  { %v1877_v52 = vld [vmem:[#allocation3 + $0x3a] ss:$2 sm:$0x3] }
 0x31f   :  { %v1840_v17 = vld [vmem:[#allocation3 + $0x40] ss:$2 sm:$0x3]  ;;  %v1848_v21 = vld [vmem:[#allocation3 + $0x41] ss:$2 sm:$0x3] }
 0x320   :  { %1914 = vst [vmem:[#allocation1 + $0x3] ss:$4 sm:$0xff] %v1840_v17  ;;  %v1856_v26 = vld [vmem:[#allocation3 + $0x42] ss:$2 sm:$0x3]  ;;  %v2074_v17 = vld [vmem:[%s4431_s5 + $0x150] sm:$0xff] }
 0x321   :  { %v1885_v63 = vld [vmem:[#allocation3 + $0x40] ss:$2 sm:$0x3]  ;;  %2155 = vmatpush.msrb.mxu2 %v2074_v17  ;;  %v2080_v17 = vld [vmem:[%s4431_s5 + $0x180] sm:$0xff] }
 0x327   :  { %v3981_v19 = vld.sshfl [vmem:[#allocation1] sm:$0xff pattern:$0x73625140] }
 0x328   :  { %1921 = vst [vmem:[#allocation1] ss:$4 sm:$0xff] %v1842_v18  ;;  %v1891_v18 = vld [vmem:[#allocation3 + $0x21] ss:$2 sm:$0x3] }
 0x329   :  { %1923 = vst [vmem:[#allocation1 + $0x1] ss:$4 sm:$0xff] %v1844_v20 }
 0x32a   :  { %1925 = vst [vmem:[#allocation1 + $0x2] ss:$4 sm:$0xff] %v1846_v15  ;;  %v2038_v15 = vld [vmem:[%s4431_s5 + $0x30] sm:$0xff] }
 0x32b   :  { %1927 = vst [vmem:[#allocation1 + $0x3] ss:$4 sm:$0xff] %v1848_v21  ;;  %v2054_v21 = vld [vmem:[%s4431_s5 + $0xb0] sm:$0xff]  ;;  %2119 = vmatpush.msra.mxu3 %v2038_v15  ;;  %v2226_v15 = vld [vmem:[%s4433_s7 + $0x58] sm:$0xff] }
 0x32c   :  { %2139 = vmatpush.msrb.mxu1 %v2054_v21  ;;  %v2225_v21 = vld [vmem:[%s4433_s7 + $0x50] sm:$0xff] }
 0x332   :  { %v3983_v25 = vld.sshfl [vmem:[#allocation1] sm:$0xff pattern:$0x73625140] }
 0x333   :  { %1936 = vst [vmem:[#allocation1] ss:$4 sm:$0xff] %v1850_v22  ;;  %v2073_v22 = vld [vmem:[%s4431_s5 + $0x148] sm:$0xff] }
 0x334   :  { %1938 = vst [vmem:[#allocation1 + $0x1] ss:$4 sm:$0xff] %v1852_v0  ;;  %v2053_v0 = vld [vmem:[%s4431_s5 + $0xa8] sm:$0xff]  ;;  %2156 = vmatpush.msrb.mxu2 %v2073_v22 }
 0x335   :  { %1940 = vst [vmem:[#allocation1 + $0x2] ss:$4 sm:$0xff] %v1854_v23  ;;  %v1893_v23 = vld [vmem:[#allocation3 + $0x41] ss:$2 sm:$0x3]  ;;  %2140 = vmatpush.msrb.mxu1 %v2053_v0 }
 0x336   :  { %1942 = vst [vmem:[#allocation1 + $0x3] ss:$4 sm:$0xff] %v1856_v26  ;;  %v2072_v26 = vld [vmem:[%s4431_s5 + $0x140] sm:$0xff]  ;;  %v2224_v22 = vld [vmem:[%s4433_s7 + $0x48] sm:$0xff] }
 0x337   :  { %2157 = vmatpush.msrb.mxu2 %v2072_v26 }
 0x33d   :  { %v3985_v29 = vld.sshfl [vmem:[#allocation1] sm:$0xff pattern:$0x73625140] }
 0x33e   :  { %1953 = vst [vmem:[#allocation1 + $0x2] ss:$4 sm:$0xff] %v1861_v27 }
 0x33f   :  { %1949 = vst [vmem:[#allocation1] ss:$4 sm:$0xff] %v1857_v30  ;;  %v2036_v30 = vld [vmem:[%s4431_s5 + $0x20] sm:$0xff] }
 0x340   :  { %1951 = vst [vmem:[#allocation1 + $0x1] ss:$4 sm:$0xff] %v1859_v32  ;;  %v2052_v32 = vld [vmem:[%s4431_s5 + $0xa0] sm:$0xff] }
 0x341   :  { %2141 = vmatpush.msrb.mxu1 %v2052_v32 }
 0x35c   :  { %v1734_v3 = vpop.f32.mrf.mxu1 }
 0x35d   :  { %v1735_v33 = vadd.f32 %v3950_v31, %v1734_v3  ;;  %v2071_v3 = vld [vmem:[%s4431_s5 + $0x138] sm:$0xff] }
 0x35e   :  { %2158 = vmatpush.msrb.mxu2 %v2071_v3 }
 0x362   :  { %v1763_v34 = vpop.f32.mrf.mxu2 }
 0x363   :  { %v1764_v35 = vadd.f32 %v1763_v34, %v1735_v33  ;;  %v2035_v33 = vld [vmem:[%s4431_s5 + $0x18] sm:$0xff] }
 0x364   :  { %v2051_v34 = vld [vmem:[%s4431_s5 + $0x98] sm:$0xff] }
 0x365   :  { %v1793_v37 = vadd.f32 %v1792_v36, %v1764_v35  ;;  %v2070_v35 = vld [vmem:[%s4431_s5 + $0x130] sm:$0xff]  ;;  %2142 = vmatpush.msrb.mxu1 %v2051_v34 }
 0x366   :  { %v2034_v36 = vld [vmem:[%s4431_s5 + $0x10] sm:$0xff]  ;;  %2159 = vmatpush.msrb.mxu2 %v2070_v35 }
 0x367   :  { %v1798_v39 = vmax.f32 %v1793_v37, 0.0  ;;  %v2050_v37 = vld [vmem:[%s4431_s5 + $0x90] sm:$0xff] }
 0x368   :  { %2143 = vmatpush.msrb.mxu1 %v2050_v37  ;;  %v2219_v37 = vld [vmem:[%s4433_s7 + $0x20] sm:$0xff] }
 0x369   :  { %v1819_v40 = vrot.slane %v1798_v39, 4  ;;  %1832 = vst.msk [vmem:[#allocation3 + $0x49] sm:$0xf] %vm1825_vm14, %v1798_v39  ;;  %v1897_v39 = vld [vmem:[#allocation3 + $0x12] ss:$2 sm:$0x3] }
 0x36b   :  { %1833 = vst.msk [vmem:[#allocation3 + $0x51] sm:$0xf] %vm1825_vm14, %v1819_v40  ;;  %v2033_v40 = vld [vmem:[%s4431_s5 + $0x8] sm:$0xff] }
 0x370   :  { %v1863_v41 = vld [vmem:[#allocation3 + $0x48] ss:$2 sm:$0x3]  ;;  %v1871_v31 = vld [vmem:[#allocation3 + $0x49] ss:$2 sm:$0x3] }
 0x371   :  { %1955 = vst [vmem:[#allocation1 + $0x3] ss:$4 sm:$0xff] %v1863_v41  ;;  %v1879_v53 = vld [vmem:[#allocation3 + $0x4a] ss:$2 sm:$0x3] }
 0x372   :  { %v1887_v4 = vld [vmem:[#allocation3 + $0x50] ss:$2 sm:$0x3]  ;;  %v1895_v27 = vld [vmem:[#allocation3 + $0x51] ss:$2 sm:$0x3] }
 0x373   :  { %v1899_v41 = vld [vmem:[#allocation3 + $0x22] ss:$2 sm:$0x3]  ;;  %v1903_v55 = vld [vmem:[#allocation3 + $0x52] ss:$2 sm:$0x3] }
 0x378   :  { %v3990_v45 = vld.sshfl [vmem:[#allocation1] sm:$0xff pattern:$0x73625140] }
 0x379   :  { %1964 = vst [vmem:[#allocation1] ss:$4 sm:$0xff] %v1865_v44  ;;  %v2049_v44 = vld [vmem:[%s4431_s5 + $0x88] sm:$0xff] }
 0x37a   :  { %1966 = vst [vmem:[#allocation1 + $0x1] ss:$4 sm:$0xff] %v1867_v46  ;;  %2144 = vmatpush.msrb.mxu1 %v2049_v44  ;;  %v2261_v44 = vld [vmem:[%s4433_s7 + $0x170] sm:$0xff] }
 0x37b   :  { %1968 = vst [vmem:[#allocation1 + $0x2] ss:$4 sm:$0xff] %v1869_v47  ;;  %v2032_v47 = vld [vmem:[%s4431_s5] sm:$0xff] }
 0x37c   :  { %1970 = vst [vmem:[#allocation1 + $0x3] ss:$4 sm:$0xff] %v1871_v31 }
 0x383   :  { %v3992_v50 = vld.sshfl [vmem:[#allocation1] sm:$0xff pattern:$0x73625140] }
 0x384   :  { %1977 = vst [vmem:[#allocation1] ss:$4 sm:$0xff] %v1873_v48  ;;  %v2095_v48 = vld [vmem:[%s4431_s5 + $0x1f8] sm:$0xff] }
 0x385   :  { %1979 = vst [vmem:[#allocation1 + $0x1] ss:$4 sm:$0xff] %v1875_v51  ;;  %v2048_v51 = vld [vmem:[%s4431_s5 + $0x80] sm:$0xff] }
 0x386   :  { %1981 = vst [vmem:[#allocation1 + $0x2] ss:$4 sm:$0xff] %v1877_v52  ;;  %v1901_v52 = vld [vmem:[#allocation3 + $0x42] ss:$2 sm:$0x3]  ;;  %2145 = vmatpush.msrb.mxu1 %v2048_v51  ;;  %v2243_v51 = vld [vmem:[%s4433_s7 + $0xe0] sm:$0xff] }
 0x387   :  { %1983 = vst [vmem:[#allocation1 + $0x3] ss:$4 sm:$0xff] %v1879_v53  ;;  %v2103_v53 = vld [vmem:[%s4431_s5 + $0x238] sm:$0xff] }
 0x388   :  { %2198 = vmatpush.msra.mxu1 %v2103_v53  ;;  %v2215_v53 = vld [vmem:[%s4433_s7] sm:$0xff] }
 0x38a   :  { %2199 = vmatpush.msra.mxu1 %v2102_v42  ;;  %v2278_v42 = vld [vmem:[%s4433_s7 + $0x1f8] sm:$0xff] }
 0x38e   :  { %v1984_v1 = vld.sshfl [vmem:[#allocation1] sm:$0xff pattern:$0x73625140] }
 0x38f   :  { %v2785_v24 = vpack.i.bf16 %v1984_v1, %v3983_v25  ;;  %1992 = vst [vmem:[#allocation1] ss:$4 sm:$0xff] %v1881_v59  ;;  %v2037_v25 = vld [vmem:[%s4431_s5 + $0x28] sm:$0xff]  ;;  %v2100_v1 = vld [vmem:[%s4431_s5 + $0x220] sm:$0xff] }
 0x390   :  { %1994 = vst [vmem:[#allocation1 + $0x1] ss:$4 sm:$0xff] %v1883_v16  ;;  %2120 = vmatpush.msra.mxu3 %v2037_v25  ;;  %v2069_v59 = vld [vmem:[%s4431_s5 + $0x128] sm:$0xff] }
 0x391   :  { %2786 = vrot.lane.b32.xlu1 %v2785_v24, %s2835_s23  ;;  %1996 = vst [vmem:[#allocation1 + $0x2] ss:$4 sm:$0xff] %v1885_v63  ;;  %v2101_v16 = vld [vmem:[%s4431_s5 + $0x228] sm:$0xff]  ;;  %2160 = vmatpush.msrb.mxu2 %v2069_v59  ;;  %v2088_v63 = vld [vmem:[%s4431_s5 + $0x1c0] sm:$0xff]  ;;  %v2099_v24 = vld [vmem:[%s4431_s5 + $0x218] sm:$0xff] }
 0x392   :  { %1998 = vst [vmem:[#allocation1 + $0x3] ss:$4 sm:$0xff] %v1887_v4  ;;  %2121 = vmatpush.msra.mxu3 %v2036_v30  ;;  %2200 = vmatpush.msra.mxu1 %v2101_v16  ;;  %v2087_v4 = vld [vmem:[%s4431_s5 + $0x1b8] sm:$0xff]  ;;  %v2256_v59 = vld [vmem:[%s4433_s7 + $0x148] sm:$0xff]  ;;  %v2239_v16 = vld [vmem:[%s4433_s7 + $0xc0] sm:$0xff] }
 0x393   :  { %2161 = vmatpush.msrb.mxu2 %v2068_v61  ;;  %v2255_v61 = vld [vmem:[%s4433_s7 + $0x140] sm:$0xff] }
 0x394   :  { %2122 = vmatpush.msra.mxu3 %v2035_v33  ;;  %2201 = vmatpush.msra.mxu1 %v2100_v1  ;;  %v2238_v1 = vld [vmem:[%s4433_s7 + $0xb8] sm:$0xff] }
 0x395   :  { %2162 = vmatpush.msrb.mxu2 %v2067_v2  ;;  %v2254_v2 = vld [vmem:[%s4433_s7 + $0x138] sm:$0xff] }
 0x396   :  { %2123 = vmatpush.msra.mxu3 %v2034_v36  ;;  %2202 = vmatpush.msra.mxu1 %v2099_v24  ;;  %v2237_v24 = vld [vmem:[%s4433_s7 + $0xb0] sm:$0xff] }
 0x397   :  { %2163 = vmatpush.msrb.mxu2 %v2066_v5  ;;  %v2253_v5 = vld [vmem:[%s4433_s7 + $0x130] sm:$0xff] }
 0x398   :  { %2124 = vmatpush.msra.mxu3 %v2033_v40  ;;  %2203 = vmatpush.msra.mxu1 %v2098_v62  ;;  %v2218_v40 = vld [vmem:[%s4433_s7 + $0x18] sm:$0xff]  ;;  %v2236_v62 = vld [vmem:[%s4433_s7 + $0xa8] sm:$0xff] }
 0x399   :  { %v4071_v20 = vld.sshfl [vmem:[#allocation1] sm:$0xff pattern:$0x73625140]  ;;  %2164 = vmatpush.msrb.mxu2 %v2065_v6  ;;  %v2252_v6 = vld [vmem:[%s4433_s7 + $0x128] sm:$0xff] }
 0x39a   :  { %2005 = vst [vmem:[#allocation1] ss:$4 sm:$0xff] %v1889_v38  ;;  %2125 = vmatpush.msra.mxu3 %v2032_v47  ;;  %2204 = vmatpush.msra.mxu1 %v2097_v54  ;;  %v2081_v38 = vld [vmem:[%s4431_s5 + $0x188] sm:$0xff]  ;;  %v2235_v54 = vld [vmem:[%s4433_s7 + $0xa0] sm:$0xff] }
 0x39b   :  { %2007 = vst [vmem:[#allocation1 + $0x1] ss:$4 sm:$0xff] %v1891_v18  ;;  %2165 = vmatpush.msrb.mxu2 %v2064_v8  ;;  %v2227_v18 = vld [vmem:[%s4433_s7 + $0x60] sm:$0xff]  ;;  %v2244_v47 = vld [vmem:[%s4433_s7 + $0xe8] sm:$0xff] }
 0x39c   :  { %2009 = vst [vmem:[#allocation1 + $0x2] ss:$4 sm:$0xff] %v1893_v23  ;;  %2170 = vmatpush.msrb.mxu3 %v2095_v48  ;;  %2205 = vmatpush.msra.mxu1 %v2096_v28  ;;  %v2223_v23 = vld [vmem:[%s4433_s7 + $0x40] sm:$0xff]  ;;  %v2216_v48 = vld [vmem:[%s4433_s7 + $0x8] sm:$0xff]  ;;  %v2234_v28 = vld [vmem:[%s4433_s7 + $0x98] sm:$0xff] }
 0x39d   :  { %2011 = vst [vmem:[#allocation1 + $0x3] ss:$4 sm:$0xff] %v1895_v27  ;;  %2293 = vmatpush.msra.mxu2 %v2230_v11  ;;  %v2251_v8 = vld [vmem:[%s4433_s7 + $0x120] sm:$0xff]  ;;  %v2233_v11 = vld [vmem:[%s4433_s7 + $0x90] sm:$0xff] }
 0x39f   :  { %2294 = vmatpush.msra.mxu2 %v2229_v13  ;;  %v2249_v13 = vld [vmem:[%s4433_s7 + $0x110] sm:$0xff] }
 0x3a1   :  { %2295 = vmatpush.msra.mxu2 %v2228_v14  ;;  %v2232_v14 = vld [vmem:[%s4433_s7 + $0x88] sm:$0xff] }
 0x3a3   :  { %2296 = vmatpush.msra.mxu2 %v2227_v18  ;;  %v2797_v18 = vld [vmem:[%s4432_s6] ss:$0 sm:$0xff] }
 0x3a4   :  { %v2012_v46 = vld.sshfl [vmem:[#allocation1] sm:$0xff pattern:$0x73625140] }
 0x3a5   :  { %v2790_v31 = vpack.i.bf16 %v2012_v46, %v3990_v45  ;;  %2020 = vst [vmem:[#allocation1] ss:$4 sm:$0xff] %v1897_v39  ;;  %v2094_v45 = vld [vmem:[%s4431_s5 + $0x1f0] sm:$0xff]  ;;  %2297 = vmatpush.msra.mxu2 %v2226_v15  ;;  %v2262_v39 = vld [vmem:[%s4433_s7 + $0x178] sm:$0xff]  ;;  %v2268_v15 = vld [vmem:[%s4433_s7 + $0x1a8] sm:$0xff] }
 0x3a6   :  { %2022 = vst [vmem:[#allocation1 + $0x1] ss:$4 sm:$0xff] %v1899_v41  ;;  %2171 = vmatpush.msrb.mxu3 %v2094_v45  ;;  %v2245_v41 = vld [vmem:[%s4433_s7 + $0xf0] sm:$0xff]  ;;  %v2258_v45 = vld [vmem:[%s4433_s7 + $0x158] sm:$0xff] }
 0x3a7   :  { %2791 = vrot.lane.b32.xlu2 %v2790_v31, %s2835_s23  ;;  %2024 = vst [vmem:[#allocation1 + $0x2] ss:$4 sm:$0xff] %v1901_v52  ;;  %2298 = vmatpush.msra.mxu2 %v2225_v21  ;;  %v2217_v46 = vld [vmem:[%s4433_s7 + $0x10] sm:$0xff]  ;;  %v2260_v31 = vld [vmem:[%s4433_s7 + $0x168] sm:$0xff]  ;;  %v2259_v52 = vld [vmem:[%s4433_s7 + $0x160] sm:$0xff] }
 0x3a8   :  { %2026 = vst [vmem:[#allocation1 + $0x3] ss:$4 sm:$0xff] %v1903_v55  ;;  %2172 = vmatpush.msrb.mxu3 %v2093_v56  ;;  %v2242_v55 = vld [vmem:[%s4433_s7 + $0xd8] sm:$0xff]  ;;  %v2241_v56 = vld [vmem:[%s4433_s7 + $0xd0] sm:$0xff]  ;;  %v2231_v21 = vld [vmem:[%s4433_s7 + $0x80] sm:$0xff] }
 0x3a9   :  { %2299 = vmatpush.msra.mxu2 %v2224_v22  ;;  %v2247_v22 = vld [vmem:[%s4433_s7 + $0x100] sm:$0xff] }
 0x3aa   :  { %2173 = vmatpush.msrb.mxu3 %v2092_v57  ;;  %v2257_v57 = vld [vmem:[%s4433_s7 + $0x150] sm:$0xff] }
 0x3ab   :  { %2300 = vmatpush.msra.mxu2 %v2223_v23  ;;  %v2267_v23 = vld [vmem:[%s4433_s7 + $0x1a0] sm:$0xff] }
 0x3ac   :  { %2174 = vmatpush.msrb.mxu3 %v2091_v58  ;;  %v2277_v58 = vld [vmem:[%s4433_s7 + $0x1f0] sm:$0xff] }
 0x3ae   :  { %2175 = vmatpush.msrb.mxu3 %v2090_v49  ;;  %v2240_v49 = vld [vmem:[%s4433_s7 + $0xc8] sm:$0xff] }
 0x3af   :  { %v2027_v35 = vld.sshfl [vmem:[#allocation1] sm:$0xff pattern:$0x73625140] }
 0x3b0   :  { %2176 = vmatpush.msrb.mxu3 %v2089_v60  ;;  %v2276_v60 = vld [vmem:[%s4433_s7 + $0x1e8] sm:$0xff] }
 0x3b2   :  { %2177 = vmatpush.msrb.mxu3 %v2088_v63  ;;  %v2275_v63 = vld [vmem:[%s4433_s7 + $0x1e0] sm:$0xff] }
 0x3b4   :  { %2178 = vmatpush.msrb.mxu3 %v2087_v4  ;;  %v2274_v4 = vld [vmem:[%s4433_s7 + $0x1d8] sm:$0xff] }
 0x3b6   :  { %2179 = vmatpush.msrb.mxu3 %v2086_v12  ;;  %v2273_v12 = vld [vmem:[%s4433_s7 + $0x1d0] sm:$0xff] }
 0x3b8   :  { %2180 = vmatpush.msrb.mxu3 %v2085_v7  ;;  %v2272_v7 = vld [vmem:[%s4433_s7 + $0x1c8] sm:$0xff] }
 0x3ba   :  { %2181 = vmatpush.msrb.mxu3 %v2084_v9  ;;  %v2271_v9 = vld [vmem:[%s4433_s7 + $0x1c0] sm:$0xff] }
 0x3bc   :  { %2182 = vmatpush.msrb.mxu3 %v2083_v10  ;;  %v2250_v10 = vld [vmem:[%s4433_s7 + $0x118] sm:$0xff] }
 0x3be   :  { %2183 = vmatpush.msrb.mxu3 %v2082_v43  ;;  %v2270_v43 = vld [vmem:[%s4433_s7 + $0x1b8] sm:$0xff] }
 0x3c0   :  { %2184 = vmatpush.msrb.mxu3 %v2081_v38  ;;  %v2269_v38 = vld [vmem:[%s4433_s7 + $0x1b0] sm:$0xff] }
 0x3c2   :  { %2185 = vmatpush.msrb.mxu3 %v2080_v17  ;;  %v2248_v17 = vld [vmem:[%s4433_s7 + $0x108] sm:$0xff] }
 0x401   :  { %v2792_v25 = vpop.permute.xlu2 %2791 }
 0x402   :  { %v2793_v0 = vunpack.i.l.bf16 %v2792_v25  ;;  %v2794_v34 = vunpack.i.h.bf16 %v2792_v25 }
 0x403   :  { %v2787_v26 = vpop.permute.xlu1 %2786 }
 0x404   :  { %v2029_v27 = vsel %vm1638_vm11, %v3985_v29, %v2793_v0  ;;  %v2789_v30 = vunpack.i.h.bf16 %v2787_v26  ;;  %v2788_v32 = vunpack.i.l.bf16 %v2787_v26  ;;  %v2031_v36 = vsel %vm1638_vm11, %v4071_v20, %v2794_v34  ;;  %v2222_v29 = vld [vmem:[%s4433_s7 + $0x38] sm:$0xff] }
 0x405   :  { %2146 = vmatmul.f32.vlgmr.msrb.gmra.mxu1 %v2029_v27  ;;  %2301 = vmatpush.msra.mxu2 %v2222_v29  ;;  %v2246_v20 = vld [vmem:[%s4433_s7 + $0xf8] sm:$0xff]  ;;  %v2263_v29 = vld [vmem:[%s4433_s7 + $0x180] sm:$0xff] }
 0x406   :  { %v2028_v3 = vsel %vm1638_vm11, %v3981_v19, %v2788_v32  ;;  %v2030_v33 = vsel %vm1638_vm11, %v3992_v50, %v2789_v30  ;;  %v2221_v19 = vld [vmem:[%s4433_s7 + $0x30] sm:$0xff]  ;;  %v2220_v50 = vld [vmem:[%s4433_s7 + $0x28] sm:$0xff]  ;;  %2333 = vmatpush.msrb.mxu1 %v2262_v39  ;;  %v2266_v27 = vld [vmem:[%s4433_s7 + $0x198] sm:$0xff] }
 0x407   :  { %2126 = vmatmul.f32.vlgmr.msra.gmra.mxu3 %v2028_v3  ;;  %2166 = vmatmul.f32.vlgmr.msrb.gmra.mxu2 %v2030_v33  ;;  %v2265_v32 = vld [vmem:[%s4433_s7 + $0x190] sm:$0xff]  ;;  %v2264_v3 = vld [vmem:[%s4433_s7 + $0x188] sm:$0xff] }
 0x408   :  { %2302 = vmatpush.msra.mxu2 %v2221_v19  ;;  %2313 = vmatpush.msra.mxu3 %v2246_v20 }
 0x409   :  { %2334 = vmatpush.msrb.mxu1 %v2261_v44 }
 0x40a   :  { %2303 = vmatpush.msra.mxu2 %v2220_v50  ;;  %2314 = vmatpush.msra.mxu3 %v2245_v41 }
 0x40b   :  { %2335 = vmatpush.msrb.mxu1 %v2260_v31 }
 0x40c   :  { %2304 = vmatpush.msra.mxu2 %v2219_v37  ;;  %2315 = vmatpush.msra.mxu3 %v2244_v47 }
 0x40d   :  { %2716 = vmatmul.msk.f32.vlgmr.msra.gmra.mxu1 %vm1638_vm11, %v2027_v35  ;;  %v2837_v35 = vmov 1935823168  }
 0x40e   :  { %2305 = vmatpush.msra.mxu2 %v2218_v40  ;;  %2316 = vmatpush.msra.mxu3 %v2243_v51 }
 0x40f   :  { %2186 = vmatmul.f32.vlgmr.msrb.gmra.mxu3 %v2031_v36  ;;  %2336 = vmatpush.msrb.mxu1 %v2259_v52  ;;  %v2212_v36 = vunpack.c.l.s4 %v2837_v35 }
 0x410   :  { %2306 = vmatpush.msra.mxu2 %v2217_v46  ;;  %2317 = vmatpush.msra.mxu3 %v2242_v55 }
 0x411   :  { %2337 = vmatpush.msrb.mxu1 %v2258_v45  ;;  %v2213_v39 = vunpack.c.0.s8 %v2212_v36 }
 0x412   :  { %2307 = vmatpush.msra.mxu2 %v2216_v48  ;;  %2318 = vmatpush.msra.mxu3 %v2241_v56  ;;  %v2798_v48 = vld [vmem:[%s4434_s8] ss:$0 sm:$0xff] }
 0x413   :  { %2338 = vmatpush.msrb.mxu1 %v2257_v57 }
 0x414   :  { %2308 = vmatpush.msra.mxu2 %v2215_v53  ;;  %2319 = vmatpush.msra.mxu3 %v2240_v49 }
 0x415   :  { %2339 = vmatpush.msrb.mxu1 %v2256_v59 }
 0x416   :  { %2353 = vmatpush.msrb.mxu2 %v2278_v42  ;;  %2320 = vmatpush.msra.mxu3 %v2239_v16 }
 0x417   :  { %2340 = vmatpush.msrb.mxu1 %v2255_v61 }
 0x418   :  { %2354 = vmatpush.msrb.mxu2 %v2277_v58  ;;  %2321 = vmatpush.msra.mxu3 %v2238_v1 }
 0x419   :  { %2341 = vmatpush.msrb.mxu1 %v2254_v2 }
 0x41a   :  { %2355 = vmatpush.msrb.mxu2 %v2276_v60  ;;  %2322 = vmatpush.msra.mxu3 %v2237_v24 }
 0x41b   :  { %2342 = vmatpush.msrb.mxu1 %v2253_v5 }
 0x41c   :  { %2356 = vmatpush.msrb.mxu2 %v2275_v63  ;;  %2323 = vmatpush.msra.mxu3 %v2236_v62 }
 0x41d   :  { %2343 = vmatpush.msrb.mxu1 %v2252_v6 }
 0x41e   :  { %2357 = vmatpush.msrb.mxu2 %v2274_v4  ;;  %2324 = vmatpush.msra.mxu3 %v2235_v54 }
 0x41f   :  { %2344 = vmatpush.msrb.mxu1 %v2251_v8 }
 0x420   :  { %2358 = vmatpush.msrb.mxu2 %v2273_v12  ;;  %2325 = vmatpush.msra.mxu3 %v2234_v28 }
 0x421   :  { %2345 = vmatpush.msrb.mxu1 %v2250_v10 }
 0x422   :  { %2359 = vmatpush.msrb.mxu2 %v2272_v7  ;;  %2326 = vmatpush.msra.mxu3 %v2233_v11 }
 0x423   :  { %2346 = vmatpush.msrb.mxu1 %v2249_v13 }
 0x424   :  { %2360 = vmatpush.msrb.mxu2 %v2271_v9  ;;  %2327 = vmatpush.msra.mxu3 %v2232_v14 }
 0x425   :  { %2347 = vmatpush.msrb.mxu1 %v2248_v17 }
 0x426   :  { %2361 = vmatpush.msrb.mxu2 %v2270_v43  ;;  %2328 = vmatpush.msra.mxu3 %v2231_v21 }
 0x427   :  { %2348 = vmatpush.msrb.mxu1 %v2247_v22 }
 0x428   :  { %2362 = vmatpush.msrb.mxu2 %v2269_v38 }
 0x42a   :  { %2363 = vmatpush.msrb.mxu2 %v2268_v15 }
 0x42c   :  { %2364 = vmatpush.msrb.mxu2 %v2267_v23 }
 0x42e   :  { %2365 = vmatpush.msrb.mxu2 %v2266_v27 }
 0x430   :  { %2366 = vmatpush.msrb.mxu2 %v2265_v32 }
 0x432   :  { %2367 = vmatpush.msrb.mxu2 %v2264_v3 }
 0x434   :  { %2368 = vmatpush.msrb.mxu2 %v2263_v29 }
 0x482   :  { %v2147_v25 = vpop.f32.mrf.mxu1 }
 0x48a   :  { %v2127_v0 = vpop.f32.mrf.mxu3  ;;  %v2167_v33 = vpop.f32.mrf.mxu2 }
 0x48b   :  { %v2128_v26 = vadd.f32 %v2797_v18, %v2127_v0  ;;  %v2207_v37 = vpop.f32.mrf.mxu1 }
 0x48d   :  { %v2148_v30 = vadd.f32 %v2147_v25, %v2128_v26 }
 0x48f   :  { %v2168_v34 = vadd.f32 %v2167_v33, %v2148_v30 }
 0x492   :  { %v2187_v19 = vpop.f32.mrf.mxu3 }
 0x493   :  { %v2188_v50 = vadd.f32 %v2187_v19, %v2168_v34 }
 0x495   :  { %v2208_v20 = vadd.f32 %v2207_v37, %v2188_v50 }
 0x497   :  { %v2210_v40 = vmax.f32 %v2208_v20, 0.0 }
 0x499   :  { %v2214_v41 = vperm.slane %v2210_v40, %v2213_v39 }
 0x49b   :  { %2284 = vst [vmem:[#allocation1] ss:$4 sm:$0xff] %v2214_v41 }
 0x4a2   :  { %v2285_v44 = vld.sshfl [vmem:[#allocation1] sm:$0xff pattern:$0x73625140]  ;;  %v2286_v46 = vld.sshfl [vmem:[#allocation1 + $0x8] sm:$0xff pattern:$0x73625140] }
 0x4a3   :  { %2309 = vmatmul.f32.vlgmr.msra.gmra.mxu2 %v2285_v44  ;;  %2329 = vmatmul.f32.vlgmr.msra.gmra.mxu3 %v2286_v46  ;;  %v2287_v47 = vld.sshfl [vmem:[#allocation1 + $0x10] sm:$0xff pattern:$0x73625140]  ;;  %v2288_v31 = vld.sshfl [vmem:[#allocation1 + $0x18] sm:$0xff pattern:$0x73625140] }
 0x4a4   :  { %2349 = vmatmul.f32.vlgmr.msrb.gmra.mxu1 %v2287_v47 }
 0x4ab   :  { %2369 = vmatmul.f32.vlgmr.msrb.gmra.mxu2 %v2288_v31 }
 0x521   :  { %v2350_v45 = vpop.f32.mrf.mxu1 }
 0x526   :  { %v2310_v51 = vpop.f32.mrf.mxu2  ;;  %v2330_v53 = vpop.f32.mrf.mxu3 }
 0x527   :  { %v2311_v52 = vadd.f32 %v2798_v48, %v2310_v51 }
 0x529   :  { %v2331_v55 = vadd.f32 %v2330_v53, %v2311_v52 }
 0x52b   :  { %v2351_v42 = vadd.f32 %v2350_v45, %v2331_v55 }
 0x52e   :  { %v2370_v56 = vpop.f32.mrf.mxu2 }
 0x52f   :  { %v2371_v57 = vadd.f32 %v2370_v56, %v2351_v42 }
 0x531   :  { %2373 = vst [vmem:[#allocation4] sm:$0x3] %v2371_v57 }
 0x532   :  { %2384 = dma.vmem_to_hbm [thread:$0]  %s2380_s21, 32, %s2382_s22, [#allocation5]  }
 0x533   :  { %2824 = dma.done.wait [#allocation5], 32  }
 0x534   :  { %2825 = vsyncadd [#allocation5], 4294967264 }
 0x535   :  { %2389 = vsyncpa [#allocation5], 1 }

</bundles_post_ra>
